<compile_context>
chip_gen: v7x
topology: tpu7x:2x2x1
jax: 0.10.0
libtpu: 0.0.40
codegen_flags: <defaults>
</compile_context>

<pallas_src>
import functools

import jax
import jax.numpy as jnp
from jax import lax
from jax.experimental import pallas as pl
from jax.experimental.pallas import tpu as pltpu


def _layernorm(x, gamma, beta, eps=1e-6):
    mu = jnp.mean(x, axis=-1, keepdims=True)
    xc = x - mu
    var = jnp.mean(xc * xc, axis=-1, keepdims=True)
    inv = lax.rsqrt(var + eps)
    return xc * inv * gamma + beta


def _gelu_exact(x):
    # torch.nn.GELU() default = exact erf formulation
    return 0.5 * x * (1.0 + lax.erf(x * (1.0 / jnp.sqrt(2.0))))


def block_kernel(n_heads, head_dim, compute_dtype,
                 x_ref, ln1_g_ref, ln1_b_ref, wqkv_ref, bqkv_ref,
                 wproj_ref, bproj_ref, ln2_g_ref, ln2_b_ref,
                 w1_ref, b1_ref, w2_ref, b2_ref, out_ref):
    b_blk, n_tok, dim = x_ref.shape
    rows = b_blk * n_tok
    d = n_heads * head_dim            # == dim
    scale = head_dim ** (-0.5)

    # ---- load every parameter exactly once ---------------------------------
    ln1_g = ln1_g_ref[...]
    ln1_b = ln1_b_ref[...]
    wqkv = wqkv_ref[...]              # compute_dtype
    bqkv = bqkv_ref[...]              # f32
    wproj = wproj_ref[...]            # compute_dtype, (D, D)
    bproj = bproj_ref[...]
    ln2_g = ln2_g_ref[...]
    ln2_b = ln2_b_ref[...]
    w1 = w1_ref[...]
    b1 = b1_ref[...]
    w2 = w2_ref[...]
    b2 = b2_ref[...]

    # Fold (B_blk, N) into a single row axis so the dense matmuls see
    # B_blk*N rows (leading-dim merge only: lane axis untouched, safe relayout).
    x = x_ref[...].astype(jnp.float32).reshape(rows, dim)

    # ---- attention branch ---------------------------------------------------
    h = _layernorm(x, ln1_g, ln1_b)                                  # (rows, D)
    qkv = jnp.dot(h.astype(compute_dtype), wqkv,
                  preferred_element_type=jnp.float32) + bqkv         # (rows, 3D)
    q = qkv[:, 0:d] * scale          # fold the 1/sqrt(hd) scale into q once
    k = qkv[:, d:2 * d]
    v = qkv[:, 2 * d:3 * d]

    att = jnp.zeros((rows, dim), jnp.float32)
    for hh in range(n_heads):        # static loop; each iter batched over B_blk
        s = hh * head_dim
        qh = q[:, s:s + head_dim].reshape(b_blk, n_tok, head_dim)
        kh = k[:, s:s + head_dim].reshape(b_blk, n_tok, head_dim)
        vh = v[:, s:s + head_dim].reshape(b_blk, n_tok, head_dim)
        # contraction on the last dim of both operands -> no K^T materialized
        sc = jnp.einsum("bnd,bmd->bnm",
                        qh.astype(compute_dtype), kh.astype(compute_dtype),
                        preferred_element_type=jnp.float32)          # (B,N,N)
        sc = sc - jnp.max(sc, axis=-1, keepdims=True)
        p = jnp.exp(sc)
        p = p * pl.reciprocal(jnp.sum(p, axis=-1, keepdims=True), approx=True)
        # attn_drop is identity (eval mode)
        oh = jnp.einsum("bnm,bmd->bnd",
                        p.astype(compute_dtype), vh.astype(compute_dtype),
                        preferred_element_type=jnp.float32)          # (B,N,hd)
        # project this head directly against its rows of wproj; accumulating
        # here removes the lane-axis concatenate of 8-wide head outputs.
        att = att + jnp.dot(oh.reshape(rows, head_dim).astype(compute_dtype),
                            wproj[s:s + head_dim, :],
                            preferred_element_type=jnp.float32)
    att = att + bproj
    # block_drop is identity (eval mode)
    x1 = x + att

    # ---- MLP branch ----------------------------------------------------------
    # NOTE: for production ViT dims (D=768, H=3072) the two MLP matmuls should
    # be K-tiled over H with an accumulator so w1/w2 need not be fully resident
    # on v7x's 64 MiB VMEM; at these dims they are tiny so they stay resident.
    h2 = _layernorm(x1, ln2_g, ln2_b)
    m = jnp.dot(h2.astype(compute_dtype), w1,
                preferred_element_type=jnp.float32) + b1
    m = _gelu_exact(m)
    m = jnp.dot(m.astype(compute_dtype), w2,
                preferred_element_type=jnp.float32) + b2
    x2 = x1 + m

    # Output store stays (B_blk, N, D): a lane-dense (B_blk, N*D) slab would
    # require a minor-dim (rows,D)->(B_blk,N*D) relayout inside the kernel
    # whose Mosaic lowering is shape-dependent; the leading-dim split below is
    # always supported.
    out_ref[...] = x2.reshape(b_blk, n_tok, dim).astype(out_ref.dtype)


def _choose_batch_block(batch, n_tokens, max_rows):
    """Largest divisor of `batch` with b_blk * n_tokens <= max_rows."""
    if n_tokens % 8 != 0:
        # Row folding assumes token dim is sublane-aligned; fall back to 1.
        return 1
    per_step = max(1, max_rows // max(n_tokens, 1))
    b_blk = min(batch, per_step)
    while batch % b_blk:
        b_blk -= 1
    return b_blk


def vit_block(x, params, n_heads, *, compute_dtype=jnp.float32,
              max_rows_per_step=512):
    B, N, D = x.shape
    assert D % n_heads == 0
    head_dim = D // n_heads
    H = params["w1"].shape[1]

    b_blk = _choose_batch_block(B, N, max_rows_per_step)
    grid = (B // b_blk,)

    # Weight matrices in compute dtype (bf16 on v6e/v7x halves VMEM + DMA);
    # biases / LN params stay f32 (added post-matmul in f32).
    p = dict(params)
    for name in ("wqkv", "wproj", "w1", "w2"):
        p[name] = params[name].astype(compute_dtype)

    # Whole-array, single-copy VMEM residents for all weights/biases
    # (constant-index blocks would otherwise be double-buffered).
    resident = pl.BlockSpec(memory_space=pltpu.MemorySpace.VMEM)
    in_specs = [pl.BlockSpec((b_blk, N, D), lambda i: (i, 0, 0))] + [resident] * 12

    # Explicit VMEM budget (weights resident once + double-buffered x/out
    # blocks + in-kernel intermediates), clamped to a safe range.
    c_bytes = jnp.dtype(compute_dtype).itemsize
    weight_bytes = (D * 3 * D + D * D + D * H + H * D) * c_bytes \
                   + (8 * D + 3 * D + H) * 4
    x_block_bytes = b_blk * N * D * 4
    interm_bytes = (b_blk * N * (3 * D + H + 4 * D) * 4
                    + b_blk * n_heads * N * N * 4)
    vmem_limit = int(min(100 * 2 ** 20,
                         max(32 * 2 ** 20,
                             2 * (weight_bytes + 4 * x_block_bytes
                                  + interm_bytes))))

    kernel = functools.partial(block_kernel, n_heads, head_dim, compute_dtype)
    return pl.pallas_call(
        kernel,
        out_shape=jax.ShapeDtypeStruct((B, N, D), x.dtype),
        grid_spec=pltpu.PrefetchScalarGridSpec(
            num_scalar_prefetch=0,
            grid=grid,
            in_specs=in_specs,
            out_specs=pl.BlockSpec((b_blk, N, D), lambda i: (i, 0, 0)),
        ),
        compiler_params=pltpu.CompilerParams(
            dimension_semantics=("parallel",),
            vmem_limit_bytes=vmem_limit),
    )(x, p["ln1_g"], p["ln1_b"], p["wqkv"], p["bqkv"], p["wproj"], p["bproj"],
      p["ln2_g"], p["ln2_b"], p["w1"], p["b1"], p["w2"], p["b2"])


def ref_block(x, p, n_heads):
    # pure-JAX reference mirroring the PyTorch forward (eval mode)
    B, N, D = x.shape
    hd = D // n_heads

    def ln(z, g, b):
        mu = z.mean(-1, keepdims=True)
        var = ((z - mu) ** 2).mean(-1, keepdims=True)
        return (z - mu) / jnp.sqrt(var + 1e-6) * g + b

    h = ln(x, p["ln1_g"], p["ln1_b"])
    qkv = h @ p["wqkv"] + p["bqkv"]
    qkv = qkv.reshape(B, N, 3, n_heads, hd).transpose(2, 0, 3, 1, 4)
    q, k, v = qkv[0], qkv[1], qkv[2]
    attn = jnp.einsum("bhnd,bhmd->bhnm", q, k) * hd ** (-0.5)
    attn = jax.nn.softmax(attn, axis=-1)
    out = jnp.einsum("bhnm,bhmd->bhnd", attn, v)
    out = out.transpose(0, 2, 1, 3).reshape(B, N, D)
    att = out @ p["wproj"] + p["bproj"]
    x = x + att
    h2 = ln(x, p["ln2_g"], p["ln2_b"])
    m = h2 @ p["w1"] + p["b1"]
    m = 0.5 * m * (1.0 + lax.erf(m / jnp.sqrt(2.0)))
    m = m @ p["w2"] + p["b2"]
    return x + m


if __name__ == "__main__":
    # small shapes consistent with the module: dim=32, n_heads=4, mlp_ratio=4
    B, N, D = 8, 8, 32
    n_heads = 4
    mlp_ratio = 4
    H = mlp_ratio * D

    key = jax.random.PRNGKey(0)
    ks = jax.random.split(key, 8)
    f32 = jnp.float32
    params = {
        "ln1_g": jnp.ones((1, D), f32),
        "ln1_b": jnp.zeros((1, D), f32),
        "wqkv": 0.02 * jax.random.normal(ks[0], (D, 3 * D), f32),
        "bqkv": 0.02 * jax.random.normal(ks[1], (1, 3 * D), f32),
        "wproj": 0.02 * jax.random.normal(ks[2], (D, D), f32),
        "bproj": 0.02 * jax.random.normal(ks[3], (1, D), f32),
        "ln2_g": jnp.ones((1, D), f32),
        "ln2_b": jnp.zeros((1, D), f32),
        "w1": 0.02 * jax.random.normal(ks[4], (D, H), f32),
        "b1": 0.02 * jax.random.normal(ks[5], (1, H), f32),
        "w2": 0.02 * jax.random.normal(ks[6], (H, D), f32),
        "b2": 0.02 * jax.random.normal(ks[7], (1, D), f32),
    }
    x = jax.random.normal(jax.random.PRNGKey(42), (B, N, D), f32)

    ref = jax.block_until_ready(ref_block(x, params, n_heads))

    # 1) default: whole batch folded into one grid step (b_blk=8, grid=(1,))
    out = jax.block_until_ready(vit_block(x, params, n_heads))
    assert out.shape == (B, N, D)
    assert jnp.allclose(out, ref, atol=2e-3, rtol=2e-3), \
        f"f32 max err {jnp.max(jnp.abs(out - ref))}"

    # 2) multi-step pipelined grid (b_blk=2 -> grid=(4,)), exercises batching path
    out_tiled = jax.block_until_ready(
        vit_block(x, params, n_heads, max_rows_per_step=16))
    assert jnp.allclose(out_tiled, ref, atol=2e-3, rtol=2e-3), \
        f"tiled max err {jnp.max(jnp.abs(out_tiled - ref))}"

    # 3) bf16 matmul operands (recommended on v6e/v7x), f32 accumulation/elementwise
    out_bf16 = jax.block_until_ready(
        vit_block(x, params, n_heads, compute_dtype=jnp.bfloat16))
    assert jnp.allclose(out_bf16, ref, atol=5e-2, rtol=5e-2), \
        f"bf16 max err {jnp.max(jnp.abs(out_bf16 - ref))}"

    print("KERNEL_OK")
</pallas_src>

<mosaic_0001>
module attributes {stable_mosaic.version = 11 : i64} {
  func.func @block_kernel(%arg0: i32, %arg1: memref<8x8x32xf32, #tpu.memory_space<vmem>>, %arg2: memref<1x32xf32, #tpu.memory_space<vmem>>, %arg3: memref<1x32xf32, #tpu.memory_space<vmem>>, %arg4: memref<32x96xf32, #tpu.memory_space<vmem>>, %arg5: memref<1x96xf32, #tpu.memory_space<vmem>>, %arg6: memref<32x32xf32, #tpu.memory_space<vmem>>, %arg7: memref<1x32xf32, #tpu.memory_space<vmem>>, %arg8: memref<1x32xf32, #tpu.memory_space<vmem>>, %arg9: memref<1x32xf32, #tpu.memory_space<vmem>>, %arg10: memref<32x128xf32, #tpu.memory_space<vmem>>, %arg11: memref<1x128xf32, #tpu.memory_space<vmem>>, %arg12: memref<128x32xf32, #tpu.memory_space<vmem>>, %arg13: memref<1x32xf32, #tpu.memory_space<vmem>>, %arg14: memref<8x8x32xf32, #tpu.memory_space<vmem>>) attributes {dimension_semantics = [#tpu.dimension_semantics<parallel>], iteration_bounds = array<i64: 1>, scalar_prefetch = 0 : i64, scratch_operands = 0 : i64, tpu.core_type = #tpu.core_type<tc>, window_params = [{transform_indices = @transform_0, window_bounds = array<i64: 8, 8, 32>}, {pipeline_mode = #tpu.pipeline_mode<synchronous>, transform_indices = @transform_1, window_bounds = array<i64: 1, 32>}, {pipeline_mode = #tpu.pipeline_mode<synchronous>, transform_indices = @transform_2, window_bounds = array<i64: 1, 32>}, {pipeline_mode = #tpu.pipeline_mode<synchronous>, transform_indices = @transform_3, window_bounds = array<i64: 32, 96>}, {pipeline_mode = #tpu.pipeline_mode<synchronous>, transform_indices = @transform_4, window_bounds = array<i64: 1, 96>}, {pipeline_mode = #tpu.pipeline_mode<synchronous>, transform_indices = @transform_5, window_bounds = array<i64: 32, 32>}, {pipeline_mode = #tpu.pipeline_mode<synchronous>, transform_indices = @transform_6, window_bounds = array<i64: 1, 32>}, {pipeline_mode = #tpu.pipeline_mode<synchronous>, transform_indices = @transform_7, window_bounds = array<i64: 1, 32>}, {pipeline_mode = #tpu.pipeline_mode<synchronous>, transform_indices = @transform_8, window_bounds = array<i64: 1, 32>}, {pipeline_mode = #tpu.pipeline_mode<synchronous>, transform_indices = @transform_9, window_bounds = array<i64: 32, 128>}, {pipeline_mode = #tpu.pipeline_mode<synchronous>, transform_indices = @transform_10, window_bounds = array<i64: 1, 128>}, {pipeline_mode = #tpu.pipeline_mode<synchronous>, transform_indices = @transform_11, window_bounds = array<i64: 128, 32>}, {pipeline_mode = #tpu.pipeline_mode<synchronous>, transform_indices = @transform_12, window_bounds = array<i64: 1, 32>}, {transform_indices = @transform_13, window_bounds = array<i64: 8, 8, 32>}]} {
    %c0 = arith.constant 0 : index
    %c0_0 = arith.constant 0 : index
    %0 = vector.load %arg2[%c0, %c0_0] : memref<1x32xf32, #tpu.memory_space<vmem>>, vector<1x32xf32>
    %c0_1 = arith.constant 0 : index
    %c0_2 = arith.constant 0 : index
    %1 = vector.load %arg3[%c0_1, %c0_2] : memref<1x32xf32, #tpu.memory_space<vmem>>, vector<1x32xf32>
    %c0_3 = arith.constant 0 : index
    %c0_4 = arith.constant 0 : index
    %2 = vector.load %arg4[%c0_3, %c0_4] : memref<32x96xf32, #tpu.memory_space<vmem>>, vector<32x96xf32>
    %c0_5 = arith.constant 0 : index
    %c0_6 = arith.constant 0 : index
    %3 = vector.load %arg5[%c0_5, %c0_6] : memref<1x96xf32, #tpu.memory_space<vmem>>, vector<1x96xf32>
    %c0_7 = arith.constant 0 : index
    %c0_8 = arith.constant 0 : index
    %4 = vector.load %arg6[%c0_7, %c0_8] : memref<32x32xf32, #tpu.memory_space<vmem>>, vector<32x32xf32>
    %c0_9 = arith.constant 0 : index
    %c0_10 = arith.constant 0 : index
    %5 = vector.load %arg7[%c0_9, %c0_10] : memref<1x32xf32, #tpu.memory_space<vmem>>, vector<1x32xf32>
    %c0_11 = arith.constant 0 : index
    %c0_12 = arith.constant 0 : index
    %6 = vector.load %arg8[%c0_11, %c0_12] : memref<1x32xf32, #tpu.memory_space<vmem>>, vector<1x32xf32>
    %c0_13 = arith.constant 0 : index
    %c0_14 = arith.constant 0 : index
    %7 = vector.load %arg9[%c0_13, %c0_14] : memref<1x32xf32, #tpu.memory_space<vmem>>, vector<1x32xf32>
    %c0_15 = arith.constant 0 : index
    %c0_16 = arith.constant 0 : index
    %8 = vector.load %arg10[%c0_15, %c0_16] : memref<32x128xf32, #tpu.memory_space<vmem>>, vector<32x128xf32>
    %c0_17 = arith.constant 0 : index
    %c0_18 = arith.constant 0 : index
    %9 = vector.load %arg11[%c0_17, %c0_18] : memref<1x128xf32, #tpu.memory_space<vmem>>, vector<1x128xf32>
    %c0_19 = arith.constant 0 : index
    %c0_20 = arith.constant 0 : index
    %10 = vector.load %arg12[%c0_19, %c0_20] : memref<128x32xf32, #tpu.memory_space<vmem>>, vector<128x32xf32>
    %c0_21 = arith.constant 0 : index
    %c0_22 = arith.constant 0 : index
    %11 = vector.load %arg13[%c0_21, %c0_22] : memref<1x32xf32, #tpu.memory_space<vmem>>, vector<1x32xf32>
    %c0_23 = arith.constant 0 : index
    %c0_24 = arith.constant 0 : index
    %c0_25 = arith.constant 0 : index
    %12 = vector.load %arg1[%c0_23, %c0_24, %c0_25] : memref<8x8x32xf32, #tpu.memory_space<vmem>>, vector<8x8x32xf32>
    %13 = vector.shape_cast %12 : vector<8x8x32xf32> to vector<64x32xf32>
    %cst = arith.constant dense<0.000000e+00> : vector<64xf32>
    %14 = vector.multi_reduction <add>, %13, %cst [1] : vector<64x32xf32> to vector<64xf32>
    %15 = vector.shape_cast %14 : vector<64xf32> to vector<64x1xf32>
    %cst_26 = arith.constant 3.200000e+01 : f32
    %16 = vector.broadcast %cst_26 : f32 to vector<64x1xf32>
    %17 = arith.divf %15, %16 : vector<64x1xf32>
    %18 = vector.broadcast %17 : vector<64x1xf32> to vector<64x32xf32>
    %19 = arith.subf %13, %18 : vector<64x32xf32>
    %20 = arith.mulf %19, %19 : vector<64x32xf32>
    %cst_27 = arith.constant dense<0.000000e+00> : vector<64xf32>
    %21 = vector.multi_reduction <add>, %20, %cst_27 [1] : vector<64x32xf32> to vector<64xf32>
    %22 = vector.shape_cast %21 : vector<64xf32> to vector<64x1xf32>
    %cst_28 = arith.constant 3.200000e+01 : f32
    %23 = vector.broadcast %cst_28 : f32 to vector<64x1xf32>
    %24 = arith.divf %22, %23 : vector<64x1xf32>
    %cst_29 = arith.constant 9.99999997E-7 : f32
    %25 = vector.broadcast %cst_29 : f32 to vector<64x1xf32>
    %26 = arith.addf %24, %25 : vector<64x1xf32>
    %27 = math.rsqrt %26 : vector<64x1xf32>
    %28 = vector.broadcast %27 : vector<64x1xf32> to vector<64x32xf32>
    %29 = arith.mulf %19, %28 : vector<64x32xf32>
    %30 = vector.broadcast %0 : vector<1x32xf32> to vector<64x32xf32>
    %31 = arith.mulf %29, %30 : vector<64x32xf32>
    %32 = vector.broadcast %1 : vector<1x32xf32> to vector<64x32xf32>
    %33 = arith.addf %31, %32 : vector<64x32xf32>
    %cst_30 = arith.constant dense<0.000000e+00> : vector<64x96xf32>
    %34 = tpu.matmul %33, %2, %cst_30 {dimension_numbers = #tpu.dot_dimension_numbers<[1], [0], [0], [1], [0, 0, 1, 1], [], []>} : vector<64x32xf32>, vector<32x96xf32>, vector<64x96xf32> -> vector<64x96xf32>
    %35 = vector.broadcast %3 : vector<1x96xf32> to vector<64x96xf32>
    %36 = arith.addf %34, %35 : vector<64x96xf32>
    %37 = vector.extract_strided_slice %36 {offsets = [0, 0], sizes = [64, 32], strides = [1, 1]} : vector<64x96xf32> to vector<64x32xf32>
    %cst_31 = arith.constant 0.353553385 : f32
    %38 = vector.broadcast %cst_31 : f32 to vector<64x32xf32>
    %39 = arith.mulf %37, %38 : vector<64x32xf32>
    %40 = vector.extract_strided_slice %36 {offsets = [0, 32], sizes = [64, 32], strides = [1, 1]} : vector<64x96xf32> to vector<64x32xf32>
    %41 = vector.extract_strided_slice %36 {offsets = [0, 64], sizes = [64, 32], strides = [1, 1]} : vector<64x96xf32> to vector<64x32xf32>
    %cst_32 = arith.constant 0.000000e+00 : f32
    %42 = vector.broadcast %cst_32 : f32 to vector<64x32xf32>
    %43 = vector.extract_strided_slice %39 {offsets = [0, 0], sizes = [64, 8], strides = [1, 1]} : vector<64x32xf32> to vector<64x8xf32>
    %44 = vector.shape_cast %43 : vector<64x8xf32> to vector<8x8x8xf32>
    %45 = vector.extract_strided_slice %40 {offsets = [0, 0], sizes = [64, 8], strides = [1, 1]} : vector<64x32xf32> to vector<64x8xf32>
    %46 = vector.shape_cast %45 : vector<64x8xf32> to vector<8x8x8xf32>
    %47 = vector.extract_strided_slice %41 {offsets = [0, 0], sizes = [64, 8], strides = [1, 1]} : vector<64x32xf32> to vector<64x8xf32>
    %48 = vector.shape_cast %47 : vector<64x8xf32> to vector<8x8x8xf32>
    "tpu.trace_start"() <{level = 10 : i32, message = "bnd,bmd->bnm"}> : () -> ()
    %cst_33 = arith.constant dense<0.000000e+00> : vector<8x8x8xf32>
    %49 = tpu.matmul %44, %46, %cst_33 {dimension_numbers = #tpu.dot_dimension_numbers<[2], [2], [1], [1], [0, 0, 0, 1, 1, 1], [0], [0]>} : vector<8x8x8xf32>, vector<8x8x8xf32>, vector<8x8x8xf32> -> vector<8x8x8xf32>
    "tpu.trace_stop"() : () -> ()
    %cst_34 = arith.constant dense<0xFF800000> : vector<8x8xf32>
    %50 = vector.multi_reduction <maximumf>, %49, %cst_34 [2] : vector<8x8x8xf32> to vector<8x8xf32>
    %51 = vector.shape_cast %50 : vector<8x8xf32> to vector<8x8x1xf32>
    %52 = vector.broadcast %51 : vector<8x8x1xf32> to vector<8x8x8xf32>
    %53 = arith.subf %49, %52 : vector<8x8x8xf32>
    %54 = math.exp %53 : vector<8x8x8xf32>
    %cst_35 = arith.constant dense<0.000000e+00> : vector<8x8xf32>
    %55 = vector.multi_reduction <add>, %54, %cst_35 [2] : vector<8x8x8xf32> to vector<8x8xf32>
    %56 = vector.shape_cast %55 : vector<8x8xf32> to vector<8x8x1xf32>
    %57 = tpu.reciprocal %56 {approx = true} : vector<8x8x1xf32> -> vector<8x8x1xf32>
    %58 = vector.broadcast %57 : vector<8x8x1xf32> to vector<8x8x8xf32>
    %59 = arith.mulf %54, %58 : vector<8x8x8xf32>
    "tpu.trace_start"() <{level = 10 : i32, message = "bnm,bmd->bnd"}> : () -> ()
    %cst_36 = arith.constant dense<0.000000e+00> : vector<8x8x8xf32>
    %60 = tpu.matmul %59, %48, %cst_36 {dimension_numbers = #tpu.dot_dimension_numbers<[2], [1], [1], [2], [0, 0, 0, 1, 1, 2], [0], [0]>} : vector<8x8x8xf32>, vector<8x8x8xf32>, vector<8x8x8xf32> -> vector<8x8x8xf32>
    "tpu.trace_stop"() : () -> ()
    %61 = vector.shape_cast %60 : vector<8x8x8xf32> to vector<64x8xf32>
    %62 = vector.extract_strided_slice %4 {offsets = [0, 0], sizes = [8, 32], strides = [1, 1]} : vector<32x32xf32> to vector<8x32xf32>
    %cst_37 = arith.constant dense<0.000000e+00> : vector<64x32xf32>
    %63 = tpu.matmul %61, %62, %cst_37 {dimension_numbers = #tpu.dot_dimension_numbers<[1], [0], [0], [1], [0, 0, 1, 1], [], []>} : vector<64x8xf32>, vector<8x32xf32>, vector<64x32xf32> -> vector<64x32xf32>
    %64 = arith.addf %42, %63 : vector<64x32xf32>
    %65 = vector.extract_strided_slice %39 {offsets = [0, 8], sizes = [64, 8], strides = [1, 1]} : vector<64x32xf32> to vector<64x8xf32>
    %66 = vector.shape_cast %65 : vector<64x8xf32> to vector<8x8x8xf32>
    %67 = vector.extract_strided_slice %40 {offsets = [0, 8], sizes = [64, 8], strides = [1, 1]} : vector<64x32xf32> to vector<64x8xf32>
    %68 = vector.shape_cast %67 : vector<64x8xf32> to vector<8x8x8xf32>
    %69 = vector.extract_strided_slice %41 {offsets = [0, 8], sizes = [64, 8], strides = [1, 1]} : vector<64x32xf32> to vector<64x8xf32>
    %70 = vector.shape_cast %69 : vector<64x8xf32> to vector<8x8x8xf32>
    "tpu.trace_start"() <{level = 10 : i32, message = "bnd,bmd->bnm"}> : () -> ()
    %cst_38 = arith.constant dense<0.000000e+00> : vector<8x8x8xf32>
    %71 = tpu.matmul %66, %68, %cst_38 {dimension_numbers = #tpu.dot_dimension_numbers<[2], [2], [1], [1], [0, 0, 0, 1, 1, 1], [0], [0]>} : vector<8x8x8xf32>, vector<8x8x8xf32>, vector<8x8x8xf32> -> vector<8x8x8xf32>
    "tpu.trace_stop"() : () -> ()
    %cst_39 = arith.constant dense<0xFF800000> : vector<8x8xf32>
    %72 = vector.multi_reduction <maximumf>, %71, %cst_39 [2] : vector<8x8x8xf32> to vector<8x8xf32>
    %73 = vector.shape_cast %72 : vector<8x8xf32> to vector<8x8x1xf32>
    %74 = vector.broadcast %73 : vector<8x8x1xf32> to vector<8x8x8xf32>
    %75 = arith.subf %71, %74 : vector<8x8x8xf32>
    %76 = math.exp %75 : vector<8x8x8xf32>
    %cst_40 = arith.constant dense<0.000000e+00> : vector<8x8xf32>
    %77 = vector.multi_reduction <add>, %76, %cst_40 [2] : vector<8x8x8xf32> to vector<8x8xf32>
    %78 = vector.shape_cast %77 : vector<8x8xf32> to vector<8x8x1xf32>
    %79 = tpu.reciprocal %78 {approx = true} : vector<8x8x1xf32> -> vector<8x8x1xf32>
    %80 = vector.broadcast %79 : vector<8x8x1xf32> to vector<8x8x8xf32>
    %81 = arith.mulf %76, %80 : vector<8x8x8xf32>
    "tpu.trace_start"() <{level = 10 : i32, message = "bnm,bmd->bnd"}> : () -> ()
    %cst_41 = arith.constant dense<0.000000e+00> : vector<8x8x8xf32>
    %82 = tpu.matmul %81, %70, %cst_41 {dimension_numbers = #tpu.dot_dimension_numbers<[2], [1], [1], [2], [0, 0, 0, 1, 1, 2], [0], [0]>} : vector<8x8x8xf32>, vector<8x8x8xf32>, vector<8x8x8xf32> -> vector<8x8x8xf32>
    "tpu.trace_stop"() : () -> ()
    %83 = vector.shape_cast %82 : vector<8x8x8xf32> to vector<64x8xf32>
    %84 = vector.extract_strided_slice %4 {offsets = [8, 0], sizes = [8, 32], strides = [1, 1]} : vector<32x32xf32> to vector<8x32xf32>
    %cst_42 = arith.constant dense<0.000000e+00> : vector<64x32xf32>
    %85 = tpu.matmul %83, %84, %cst_42 {dimension_numbers = #tpu.dot_dimension_numbers<[1], [0], [0], [1], [0, 0, 1, 1], [], []>} : vector<64x8xf32>, vector<8x32xf32>, vector<64x32xf32> -> vector<64x32xf32>
    %86 = arith.addf %64, %85 : vector<64x32xf32>
    %87 = vector.extract_strided_slice %39 {offsets = [0, 16], sizes = [64, 8], strides = [1, 1]} : vector<64x32xf32> to vector<64x8xf32>
    %88 = vector.shape_cast %87 : vector<64x8xf32> to vector<8x8x8xf32>
    %89 = vector.extract_strided_slice %40 {offsets = [0, 16], sizes = [64, 8], strides = [1, 1]} : vector<64x32xf32> to vector<64x8xf32>
    %90 = vector.shape_cast %89 : vector<64x8xf32> to vector<8x8x8xf32>
    %91 = vector.extract_strided_slice %41 {offsets = [0, 16], sizes = [64, 8], strides = [1, 1]} : vector<64x32xf32> to vector<64x8xf32>
    %92 = vector.shape_cast %91 : vector<64x8xf32> to vector<8x8x8xf32>
    "tpu.trace_start"() <{level = 10 : i32, message = "bnd,bmd->bnm"}> : () -> ()
    %cst_43 = arith.constant dense<0.000000e+00> : vector<8x8x8xf32>
    %93 = tpu.matmul %88, %90, %cst_43 {dimension_numbers = #tpu.dot_dimension_numbers<[2], [2], [1], [1], [0, 0, 0, 1, 1, 1], [0], [0]>} : vector<8x8x8xf32>, vector<8x8x8xf32>, vector<8x8x8xf32> -> vector<8x8x8xf32>
    "tpu.trace_stop"() : () -> ()
    %cst_44 = arith.constant dense<0xFF800000> : vector<8x8xf32>
    %94 = vector.multi_reduction <maximumf>, %93, %cst_44 [2] : vector<8x8x8xf32> to vector<8x8xf32>
    %95 = vector.shape_cast %94 : vector<8x8xf32> to vector<8x8x1xf32>
    %96 = vector.broadcast %95 : vector<8x8x1xf32> to vector<8x8x8xf32>
    %97 = arith.subf %93, %96 : vector<8x8x8xf32>
    %98 = math.exp %97 : vector<8x8x8xf32>
    %cst_45 = arith.constant dense<0.000000e+00> : vector<8x8xf32>
    %99 = vector.multi_reduction <add>, %98, %cst_45 [2] : vector<8x8x8xf32> to vector<8x8xf32>
    %100 = vector.shape_cast %99 : vector<8x8xf32> to vector<8x8x1xf32>
    %101 = tpu.reciprocal %100 {approx = true} : vector<8x8x1xf32> -> vector<8x8x1xf32>
    %102 = vector.broadcast %101 : vector<8x8x1xf32> to vector<8x8x8xf32>
    %103 = arith.mulf %98, %102 : vector<8x8x8xf32>
    "tpu.trace_start"() <{level = 10 : i32, message = "bnm,bmd->bnd"}> : () -> ()
    %cst_46 = arith.constant dense<0.000000e+00> : vector<8x8x8xf32>
    %104 = tpu.matmul %103, %92, %cst_46 {dimension_numbers = #tpu.dot_dimension_numbers<[2], [1], [1], [2], [0, 0, 0, 1, 1, 2], [0], [0]>} : vector<8x8x8xf32>, vector<8x8x8xf32>, vector<8x8x8xf32> -> vector<8x8x8xf32>
    "tpu.trace_stop"() : () -> ()
    %105 = vector.shape_cast %104 : vector<8x8x8xf32> to vector<64x8xf32>
    %106 = vector.extract_strided_slice %4 {offsets = [16, 0], sizes = [8, 32], strides = [1, 1]} : vector<32x32xf32> to vector<8x32xf32>
    %cst_47 = arith.constant dense<0.000000e+00> : vector<64x32xf32>
    %107 = tpu.matmul %105, %106, %cst_47 {dimension_numbers = #tpu.dot_dimension_numbers<[1], [0], [0], [1], [0, 0, 1, 1], [], []>} : vector<64x8xf32>, vector<8x32xf32>, vector<64x32xf32> -> vector<64x32xf32>
    %108 = arith.addf %86, %107 : vector<64x32xf32>
    %109 = vector.extract_strided_slice %39 {offsets = [0, 24], sizes = [64, 8], strides = [1, 1]} : vector<64x32xf32> to vector<64x8xf32>
    %110 = vector.shape_cast %109 : vector<64x8xf32> to vector<8x8x8xf32>
    %111 = vector.extract_strided_slice %40 {offsets = [0, 24], sizes = [64, 8], strides = [1, 1]} : vector<64x32xf32> to vector<64x8xf32>
    %112 = vector.shape_cast %111 : vector<64x8xf32> to vector<8x8x8xf32>
    %113 = vector.extract_strided_slice %41 {offsets = [0, 24], sizes = [64, 8], strides = [1, 1]} : vector<64x32xf32> to vector<64x8xf32>
    %114 = vector.shape_cast %113 : vector<64x8xf32> to vector<8x8x8xf32>
    "tpu.trace_start"() <{level = 10 : i32, message = "bnd,bmd->bnm"}> : () -> ()
    %cst_48 = arith.constant dense<0.000000e+00> : vector<8x8x8xf32>
    %115 = tpu.matmul %110, %112, %cst_48 {dimension_numbers = #tpu.dot_dimension_numbers<[2], [2], [1], [1], [0, 0, 0, 1, 1, 1], [0], [0]>} : vector<8x8x8xf32>, vector<8x8x8xf32>, vector<8x8x8xf32> -> vector<8x8x8xf32>
    "tpu.trace_stop"() : () -> ()
    %cst_49 = arith.constant dense<0xFF800000> : vector<8x8xf32>
    %116 = vector.multi_reduction <maximumf>, %115, %cst_49 [2] : vector<8x8x8xf32> to vector<8x8xf32>
    %117 = vector.shape_cast %116 : vector<8x8xf32> to vector<8x8x1xf32>
    %118 = vector.broadcast %117 : vector<8x8x1xf32> to vector<8x8x8xf32>
    %119 = arith.subf %115, %118 : vector<8x8x8xf32>
    %120 = math.exp %119 : vector<8x8x8xf32>
    %cst_50 = arith.constant dense<0.000000e+00> : vector<8x8xf32>
    %121 = vector.multi_reduction <add>, %120, %cst_50 [2] : vector<8x8x8xf32> to vector<8x8xf32>
    %122 = vector.shape_cast %121 : vector<8x8xf32> to vector<8x8x1xf32>
    %123 = tpu.reciprocal %122 {approx = true} : vector<8x8x1xf32> -> vector<8x8x1xf32>
    %124 = vector.broadcast %123 : vector<8x8x1xf32> to vector<8x8x8xf32>
    %125 = arith.mulf %120, %124 : vector<8x8x8xf32>
    "tpu.trace_start"() <{level = 10 : i32, message = "bnm,bmd->bnd"}> : () -> ()
    %cst_51 = arith.constant dense<0.000000e+00> : vector<8x8x8xf32>
    %126 = tpu.matmul %125, %114, %cst_51 {dimension_numbers = #tpu.dot_dimension_numbers<[2], [1], [1], [2], [0, 0, 0, 1, 1, 2], [0], [0]>} : vector<8x8x8xf32>, vector<8x8x8xf32>, vector<8x8x8xf32> -> vector<8x8x8xf32>
    "tpu.trace_stop"() : () -> ()
    %127 = vector.shape_cast %126 : vector<8x8x8xf32> to vector<64x8xf32>
    %128 = vector.extract_strided_slice %4 {offsets = [24, 0], sizes = [8, 32], strides = [1, 1]} : vector<32x32xf32> to vector<8x32xf32>
    %cst_52 = arith.constant dense<0.000000e+00> : vector<64x32xf32>
    %129 = tpu.matmul %127, %128, %cst_52 {dimension_numbers = #tpu.dot_dimension_numbers<[1], [0], [0], [1], [0, 0, 1, 1], [], []>} : vector<64x8xf32>, vector<8x32xf32>, vector<64x32xf32> -> vector<64x32xf32>
    %130 = arith.addf %108, %129 : vector<64x32xf32>
    %131 = vector.broadcast %5 : vector<1x32xf32> to vector<64x32xf32>
    %132 = arith.addf %130, %131 : vector<64x32xf32>
    %133 = arith.addf %13, %132 : vector<64x32xf32>
    %cst_53 = arith.constant dense<0.000000e+00> : vector<64xf32>
    %134 = vector.multi_reduction <add>, %133, %cst_53 [1] : vector<64x32xf32> to vector<64xf32>
    %135 = vector.shape_cast %134 : vector<64xf32> to vector<64x1xf32>
    %cst_54 = arith.constant 3.200000e+01 : f32
    %136 = vector.broadcast %cst_54 : f32 to vector<64x1xf32>
    %137 = arith.divf %135, %136 : vector<64x1xf32>
    %138 = vector.broadcast %137 : vector<64x1xf32> to vector<64x32xf32>
    %139 = arith.subf %133, %138 : vector<64x32xf32>
    %140 = arith.mulf %139, %139 : vector<64x32xf32>
    %cst_55 = arith.constant dense<0.000000e+00> : vector<64xf32>
    %141 = vector.multi_reduction <add>, %140, %cst_55 [1] : vector<64x32xf32> to vector<64xf32>
    %142 = vector.shape_cast %141 : vector<64xf32> to vector<64x1xf32>
    %cst_56 = arith.constant 3.200000e+01 : f32
    %143 = vector.broadcast %cst_56 : f32 to vector<64x1xf32>
    %144 = arith.divf %142, %143 : vector<64x1xf32>
    %cst_57 = arith.constant 9.99999997E-7 : f32
    %145 = vector.broadcast %cst_57 : f32 to vector<64x1xf32>
    %146 = arith.addf %144, %145 : vector<64x1xf32>
    %147 = math.rsqrt %146 : vector<64x1xf32>
    %148 = vector.broadcast %147 : vector<64x1xf32> to vector<64x32xf32>
    %149 = arith.mulf %139, %148 : vector<64x32xf32>
    %150 = vector.broadcast %6 : vector<1x32xf32> to vector<64x32xf32>
    %151 = arith.mulf %149, %150 : vector<64x32xf32>
    %152 = vector.broadcast %7 : vector<1x32xf32> to vector<64x32xf32>
    %153 = arith.addf %151, %152 : vector<64x32xf32>
    %cst_58 = arith.constant dense<0.000000e+00> : vector<64x128xf32>
    %154 = tpu.matmul %153, %8, %cst_58 {dimension_numbers = #tpu.dot_dimension_numbers<[1], [0], [0], [1], [0, 0, 1, 1], [], []>} : vector<64x32xf32>, vector<32x128xf32>, vector<64x128xf32> -> vector<64x128xf32>
    %155 = vector.broadcast %9 : vector<1x128xf32> to vector<64x128xf32>
    %156 = arith.addf %154, %155 : vector<64x128xf32>
    %cst_59 = arith.constant 5.000000e-01 : f32
    %157 = vector.broadcast %cst_59 : f32 to vector<64x128xf32>
    %158 = arith.mulf %157, %156 : vector<64x128xf32>
    %cst_60 = arith.constant 2.000000e+00 : f32
    %159 = math.sqrt %cst_60 : f32
    %cst_61 = arith.constant 1.000000e+00 : f32
    %160 = arith.divf %cst_61, %159 : f32
    %161 = vector.broadcast %160 : f32 to vector<64x128xf32>
    %162 = arith.mulf %156, %161 : vector<64x128xf32>
    %163 = math.erf %162 : vector<64x128xf32>
    %cst_62 = arith.constant 1.000000e+00 : f32
    %164 = vector.broadcast %cst_62 : f32 to vector<64x128xf32>
    %165 = arith.addf %164, %163 : vector<64x128xf32>
    %166 = arith.mulf %158, %165 : vector<64x128xf32>
    %cst_63 = arith.constant dense<0.000000e+00> : vector<64x32xf32>
    %167 = tpu.matmul %166, %10, %cst_63 {dimension_numbers = #tpu.dot_dimension_numbers<[1], [0], [0], [1], [0, 0, 1, 1], [], []>} : vector<64x128xf32>, vector<128x32xf32>, vector<64x32xf32> -> vector<64x32xf32>
    %168 = vector.broadcast %11 : vector<1x32xf32> to vector<64x32xf32>
    %169 = arith.addf %167, %168 : vector<64x32xf32>
    %170 = arith.addf %133, %169 : vector<64x32xf32>
    %171 = vector.shape_cast %170 : vector<64x32xf32> to vector<8x8x32xf32>
    %c0_64 = arith.constant 0 : index
    %c0_65 = arith.constant 0 : index
    %c0_66 = arith.constant 0 : index
    %172 = vector.load %arg14[%c0_64, %c0_65, %c0_66] : memref<8x8x32xf32, #tpu.memory_space<vmem>>, vector<8x8x32xf32>
    tpu.vector_store %arg14[%c0_64, %c0_65, %c0_66], %171 {strides = array<i32>} : memref<8x8x32xf32, #tpu.memory_space<vmem>>, vector<8x8x32xf32>,
    return
  }
  func.func @transform_0(%arg0: i32) -> (i32, i32, i32) {
    %c0_i32 = arith.constant 0 : i32
    %c0_i32_0 = arith.constant 0 : i32
    %c0_i32_1 = arith.constant 0 : i32
    return %arg0, %c0_i32, %c0_i32_0 : i32, i32, i32
  }
  func.func @transform_1(%arg0: i32) -> (i32, i32) {
    %c0_i32 = arith.constant 0 : i32
    %c0_i32_0 = arith.constant 0 : i32
    %c0_i32_1 = arith.constant 0 : i32
    return %c0_i32, %c0_i32_0 : i32, i32
  }
  func.func @transform_2(%arg0: i32) -> (i32, i32) {
    %c0_i32 = arith.constant 0 : i32
    %c0_i32_0 = arith.constant 0 : i32
    %c0_i32_1 = arith.constant 0 : i32
    return %c0_i32, %c0_i32_0 : i32, i32
  }
  func.func @transform_3(%arg0: i32) -> (i32, i32) {
    %c0_i32 = arith.constant 0 : i32
    %c0_i32_0 = arith.constant 0 : i32
    %c0_i32_1 = arith.constant 0 : i32
    return %c0_i32, %c0_i32_0 : i32, i32
  }
  func.func @transform_4(%arg0: i32) -> (i32, i32) {
    %c0_i32 = arith.constant 0 : i32
    %c0_i32_0 = arith.constant 0 : i32
    %c0_i32_1 = arith.constant 0 : i32
    return %c0_i32, %c0_i32_0 : i32, i32
  }
  func.func @transform_5(%arg0: i32) -> (i32, i32) {
    %c0_i32 = arith.constant 0 : i32
    %c0_i32_0 = arith.constant 0 : i32
    %c0_i32_1 = arith.constant 0 : i32
    return %c0_i32, %c0_i32_0 : i32, i32
  }
  func.func @transform_6(%arg0: i32) -> (i32, i32) {
    %c0_i32 = arith.constant 0 : i32
    %c0_i32_0 = arith.constant 0 : i32
    %c0_i32_1 = arith.constant 0 : i32
    return %c0_i32, %c0_i32_0 : i32, i32
  }
  func.func @transform_7(%arg0: i32) -> (i32, i32) {
    %c0_i32 = arith.constant 0 : i32
    %c0_i32_0 = arith.constant 0 : i32
    %c0_i32_1 = arith.constant 0 : i32
    return %c0_i32, %c0_i32_0 : i32, i32
  }
  func.func @transform_8(%arg0: i32) -> (i32, i32) {
    %c0_i32 = arith.constant 0 : i32
    %c0_i32_0 = arith.constant 0 : i32
    %c0_i32_1 = arith.constant 0 : i32
    return %c0_i32, %c0_i32_0 : i32, i32
  }
  func.func @transform_9(%arg0: i32) -> (i32, i32) {
    %c0_i32 = arith.constant 0 : i32
    %c0_i32_0 = arith.constant 0 : i32
    %c0_i32_1 = arith.constant 0 : i32
    return %c0_i32, %c0_i32_0 : i32, i32
  }
  func.func @transform_10(%arg0: i32) -> (i32, i32) {
    %c0_i32 = arith.constant 0 : i32
    %c0_i32_0 = arith.constant 0 : i32
    %c0_i32_1 = arith.constant 0 : i32
    return %c0_i32, %c0_i32_0 : i32, i32
  }
  func.func @transform_11(%arg0: i32) -> (i32, i32) {
    %c0_i32 = arith.constant 0 : i32
    %c0_i32_0 = arith.constant 0 : i32
    %c0_i32_1 = arith.constant 0 : i32
    return %c0_i32, %c0_i32_0 : i32, i32
  }
  func.func @transform_12(%arg0: i32) -> (i32, i32) {
    %c0_i32 = arith.constant 0 : i32
    %c0_i32_0 = arith.constant 0 : i32
    %c0_i32_1 = arith.constant 0 : i32
    return %c0_i32, %c0_i32_0 : i32, i32
  }
  func.func @transform_13(%arg0: i32) -> (i32, i32, i32) {
    %c0_i32 = arith.constant 0 : i32
    %c0_i32_0 = arith.constant 0 : i32
    %c0_i32_1 = arith.constant 0 : i32
    return %arg0, %c0_i32, %c0_i32_0 : i32, i32, i32
  }
}

</mosaic_0001>

<bundles_post_ra>
// kernel: tpu_custom_call.1
= control target key start
LH: loop header
LB: loop body
LE: loop exit
PB: predicated region body
PF: predicated region fallthrough
CT: control target
= control target key end

     0   :  { %vm89_vm0 = vcmask 261120   ;;  %s8969_s0 = inlined_call_operand.vmem [shape: f32[8,8,32], index: 0, kind: input, shape index: {}]   ;;  %s8970_s1 = inlined_call_operand.vmem [shape: f32[1,32], index: 1, kind: input, shape index: {}]   ;;  %s8971_s2 = inlined_call_operand.vmem [shape: f32[1,32], index: 2, kind: input, shape index: {}]   ;;  %s8972_s3 = inlined_call_operand.vmem [shape: f32[32,96], index: 3, kind: input, shape index: {}]   ;;  %s8973_s4 = inlined_call_operand.vmem [shape: f32[1,96], index: 4, kind: input, shape index: {}]   ;;  %s8974_s5 = inlined_call_operand.vmem [shape: f32[32,32], index: 5, kind: input, shape index: {}]   ;;  %s8975_s6 = inlined_call_operand.vmem [shape: f32[1,32], index: 6, kind: input, shape index: {}]   ;;  %s8976_s7 = inlined_call_operand.vmem [shape: f32[1,32], index: 7, kind: input, shape index: {}]   ;;  %s8977_s8 = inlined_call_operand.vmem [shape: f32[1,32], index: 8, kind: input, shape index: {}]   ;;  %s8978_s9 = inlined_call_operand.vmem [shape: f32[32,128], index: 9, kind: input, shape index: {}]   ;;  %s8979_s10 = inlined_call_operand.vmem [shape: f32[1,128], index: 10, kind: input, shape index: {}]   ;;  %s8980_s11 = inlined_call_operand.vmem [shape: f32[128,32], index: 11, kind: input, shape index: {}]   ;;  %s8981_s12 = inlined_call_operand.vmem [shape: f32[1,32], index: 12, kind: input, shape index: {}]   ;;  %s8982_s13 = inlined_call_operand.hbm [shape: f32[8,8,32], index: 13, kind: output, shape index: {}]  }
   0x1   :  { %v81_v0 = vld [vmem:[%s8969_s0] sm:$0xff]  ;;  %v83_v1 = vld [vmem:[%s8969_s0 + $0x10] sm:$0xff]  ;;  %v82_v2 = vld [vmem:[%s8969_s0 + $0x8] sm:$0xff] }
   0x2   :  { %v90_v3 = vsel %vm89_vm0, %v81_v0, 0.0  ;;  %v96_v4 = vsel %vm89_vm0, %v83_v1, 0.0  ;;  %v84_v5 = vld [vmem:[%s8969_s0 + $0x18] sm:$0xff]  ;;  %v93_v6 = vsel %vm89_vm0, %v82_v2, 0.0 }
   0x3   :  { %91 = vadd.xlane.f32.xlu0 %v90_v3  ;;  %97 = vadd.xlane.f32.xlu1 %v96_v4  ;;  %v99_v7 = vsel %vm89_vm0, %v84_v5, 0.0 }
   0x4   :  { %18 = vsyncpa [#allocation3], 0  ;;  %v85_v8 = vld [vmem:[%s8969_s0 + $0x20] sm:$0xff]  ;;  %v86_v9 = vld [vmem:[%s8969_s0 + $0x28] sm:$0xff]  ;;  %vm7774_vm1 = vmmov 0   ;;  %s7775_s18 = smov 96  }
   0x5   :  { %v102_v10 = vsel %vm89_vm0, %v85_v8, 0.0  ;;  %v105_v11 = vsel %vm89_vm0, %v86_v9, 0.0  ;;  %v87_v12 = vld [vmem:[%s8969_s0 + $0x30] sm:$0xff]  ;;  %v88_v13 = vld [vmem:[%s8969_s0 + $0x38] sm:$0xff]  ;;  %v47_v56 = vld [vmem:[%s8972_s3] sm:$0xff]  ;;  %vm369_vm2 = vcmask 64512  }
   0x6   :  { %v108_v14 = vsel %vm89_vm0, %v87_v12, 0.0  ;;  %v111_v15 = vsel %vm89_vm0, %v88_v13, 0.0  ;;  %v48_v57 = vld [vmem:[%s8972_s3 + $0x8] sm:$0xff]  ;;  %v49_v59 = vld [vmem:[%s8972_s3 + $0x10] sm:$0xff]  ;;  %v50_v60 = vld [vmem:[%s8972_s3 + $0x18] sm:$0xff]  ;;  %s7777_s19 = smov 88  }
   0x7   :  { %94 = vadd.xlane.f32.xlu0 %v93_v6  ;;  %100 = vadd.xlane.f32.xlu1 %v99_v7  ;;  %v7475_v58 = vpack.c.bf16 %v48_v57, %v47_v56  ;;  %v7479_v61 = vpack.c.bf16 %v50_v60, %v49_v59  ;;  %s7778_s20 = smov 120   ;;  %s7779_s21 = smov 56  }
   0x8   :  { %s7780_s22 = smov 112   ;;  %s7781_s23 = smov 80  }
   0x9   :  { %7476 = vmatprep.subr.bf16.mxu0 %v7475_v58  ;;  %s7782_s26 = smov 48   ;;  %s7783_s29 = smov 72  }
   0xa   :  { %7478 = vmatpush3.bf16.msra.mxu0 %v7475_v58  ;;  %s7784_s30 = smov 104   ;;  %s7785_s15 = smov 40  }
   0xb   :  { %103 = vadd.xlane.f32.xlu0 %v102_v10  ;;  %106 = vadd.xlane.f32.xlu1 %v105_v11 }
   0xc   :  { %7480 = vmatprep.subr.bf16.mxu0 %v7479_v61 }
   0xe   :  { %7482 = vmatpush3.bf16.msra.mxu0 %v7479_v61 }
   0xf   :  { %109 = vadd.xlane.f32.xlu0 %v108_v14  ;;  %112 = vadd.xlane.f32.xlu1 %v111_v15 }
  0x90   :  { %v92_v16 = vpop.xlane.xlu0 %91  ;;  %v98_v17 = vpop.xlane.xlu1 %97 }
  0x91   :  { %v115_v18 = vmul.f32 0.03125, %v92_v16  ;;  %v117_v19 = vmul.f32 0.03125, %v98_v17 }
  0x93   :  { %v7891_v20 = vsub.f32 %v81_v0, %v115_v18  ;;  %v7893_v21 = vsub.f32 %v83_v1, %v117_v19 }
  0x94   :  { %v95_v22 = vpop.xlane.xlu0 %94  ;;  %v101_v23 = vpop.xlane.xlu1 %100 }
  0x95   :  { %v116_v24 = vmul.f32 0.03125, %v95_v22  ;;  %v118_v25 = vmul.f32 0.03125, %v101_v23  ;;  %v131_v26 = vmul.f32 %v7891_v20, %v7891_v20  ;;  %v133_v27 = vmul.f32 %v7893_v21, %v7893_v21  ;;  %v6651_v22 = vld [vmem:[%s8970_s1] ss:$0 sm:$0xff] }
  0x97   :  { %v7899_v28 = vsub.f32 %v82_v2, %v116_v24  ;;  %v7901_v29 = vsub.f32 %v84_v5, %v118_v25  ;;  %v139_v30 = vsel %vm89_vm0, %v131_v26, 0.0  ;;  %v145_v33 = vsel %vm89_vm0, %v133_v27, 0.0  ;;  %v6652_v26 = vld [vmem:[%s8971_s2] ss:$0 sm:$0xff] }
  0x98   :  { %140 = vadd.xlane.f32.xlu0 %v139_v30  ;;  %v104_v31 = vpop.xlane.xlu0 %103  ;;  %v107_v32 = vpop.xlane.xlu1 %106 }
  0x99   :  { %v119_v34 = vmul.f32 0.03125, %v104_v31  ;;  %v120_v35 = vmul.f32 0.03125, %v107_v32  ;;  %v132_v36 = vmul.f32 %v7899_v28, %v7899_v28  ;;  %v134_v37 = vmul.f32 %v7901_v29, %v7901_v29 }
  0x9b   :  { %v7909_v38 = vsub.f32 %v85_v8, %v119_v34  ;;  %v7911_v39 = vsub.f32 %v86_v9, %v120_v35  ;;  %v142_v40 = vsel %vm89_vm0, %v132_v36, 0.0  ;;  %v148_v43 = vsel %vm89_vm0, %v134_v37, 0.0 }
  0x9c   :  { %146 = vadd.xlane.f32.xlu0 %v145_v33  ;;  %143 = vadd.xlane.f32.xlu1 %v142_v40  ;;  %v110_v41 = vpop.xlane.xlu0 %109  ;;  %v113_v42 = vpop.xlane.xlu1 %112 }
  0x9d   :  { %v121_v44 = vmul.f32 0.03125, %v110_v41  ;;  %v122_v45 = vmul.f32 0.03125, %v113_v42  ;;  %v135_v46 = vmul.f32 %v7909_v38, %v7909_v38  ;;  %v136_v47 = vmul.f32 %v7911_v39, %v7911_v39 }
  0x9f   :  { %v7919_v48 = vsub.f32 %v87_v12, %v121_v44  ;;  %v7921_v49 = vsub.f32 %v88_v13, %v122_v45  ;;  %v151_v50 = vsel %vm89_vm0, %v135_v46, 0.0  ;;  %v154_v51 = vsel %vm89_vm0, %v136_v47, 0.0 }
  0xa0   :  { %149 = vadd.xlane.f32.xlu1 %v148_v43  ;;  %152 = vadd.xlane.f32.xlu0 %v151_v50 }
  0xa1   :  { %v137_v52 = vmul.f32 %v7919_v48, %v7919_v48  ;;  %v138_v53 = vmul.f32 %v7921_v49, %v7921_v49 }
  0xa3   :  { %v157_v54 = vsel %vm89_vm0, %v137_v52, 0.0  ;;  %v160_v55 = vsel %vm89_vm0, %v138_v53, 0.0 }
  0xa4   :  { %155 = vadd.xlane.f32.xlu1 %v154_v51  ;;  %158 = vadd.xlane.f32.xlu0 %v157_v54 }
  0xa8   :  { %161 = vadd.xlane.f32.xlu1 %v160_v55 }
 0x125   :  { %v141_v62 = vpop.xlane.xlu0 %140 }
 0x126   :  { %v163_v63 = vmul.f32 0.03125, %v141_v62 }
 0x128   :  { %v171_v0 = vadd.f32 1e-06, %v163_v63 }
 0x129   :  { %v144_v1 = vpop.xlane.xlu1 %143  ;;  %v147_v2 = vpop.xlane.xlu0 %146 }
 0x12a   :  { %7565 = vrsqrt.f32 %v171_v0  ;;  %v164_v3 = vmul.f32 0.03125, %v144_v1  ;;  %v165_v4 = vmul.f32 0.03125, %v147_v2 }
 0x12c   :  { %v172_v5 = vadd.f32 1e-06, %v164_v3  ;;  %v173_v6 = vadd.f32 1e-06, %v165_v4 }
 0x12d   :  { %v150_v7 = vpop.xlane.xlu1 %149  ;;  %v153_v8 = vpop.xlane.xlu0 %152 }
 0x12e   :  { %7567 = vrsqrt.f32 %v172_v5  ;;  %v166_v9 = vmul.f32 0.03125, %v150_v7  ;;  %v167_v10 = vmul.f32 0.03125, %v153_v8 }
 0x12f   :  { %7569 = vrsqrt.f32 %v173_v6 }
 0x130   :  { %v174_v11 = vadd.f32 1e-06, %v166_v9  ;;  %v175_v12 = vadd.f32 1e-06, %v167_v10 }
 0x131   :  { %v156_v13 = vpop.xlane.xlu1 %155  ;;  %v159_v14 = vpop.xlane.xlu0 %158 }
 0x132   :  { %7571 = vrsqrt.f32 %v174_v11  ;;  %v168_v15 = vmul.f32 0.03125, %v156_v13  ;;  %v169_v16 = vmul.f32 0.03125, %v159_v14 }
 0x133   :  { %7573 = vrsqrt.f32 %v175_v12 }
 0x134   :  { %v7566_v17 = vpop.eup %7565  ;;  %v176_v18 = vadd.f32 1e-06, %v168_v15  ;;  %v177_v19 = vadd.f32 1e-06, %v169_v16 }
 0x135   :  { %v162_v23 = vpop.xlane.xlu1 %161  ;;  %v187_v24 = vmul.f32 %v7566_v17, %v7891_v20 }
 0x136   :  { %7575 = vrsqrt.f32 %v176_v18  ;;  %v170_v25 = vmul.f32 0.03125, %v162_v23 }
 0x137   :  { %7577 = vrsqrt.f32 %v177_v19  ;;  %v201_v27 = vmul.f32 %v6651_v22, %v187_v24 }
 0x138   :  { %v7568_v30 = vpop.eup %7567  ;;  %v178_v31 = vadd.f32 1e-06, %v170_v25 }
 0x139   :  { %v7570_v32 = vpop.eup %7569  ;;  %v215_v33 = vadd.f32 %v6652_v26, %v201_v27  ;;  %v188_v34 = vmul.f32 %v7568_v30, %v7899_v28 }
 0x13a   :  { %7579 = vrsqrt.f32 %v178_v31  ;;  %v189_v35 = vmul.f32 %v7570_v32, %v7893_v21 }
 0x13b   :  { %7023 = vmatprep.mubr.msk.f32.mxu0 %vm89_vm0, %v215_v33  ;;  %v202_v20 = vmul.f32 %v6651_v22, %v188_v34 }
 0x13c   :  { %v7572_v36 = vpop.eup %7571  ;;  %v203_v37 = vmul.f32 %v6651_v22, %v189_v35 }
 0x13d   :  { %v7574_v40 = vpop.eup %7573  ;;  %v216_v41 = vadd.f32 %v6652_v26, %v202_v20  ;;  %v190_v42 = vmul.f32 %v7572_v36, %v7901_v29 }
 0x13e   :  { %v217_v43 = vadd.f32 %v6652_v26, %v203_v37  ;;  %v191_v44 = vmul.f32 %v7574_v40, %v7909_v38 }
 0x13f   :  { %7024 = vmatmul.mubr.msk.f32.vlgmr.msra.gmra.mrb[0].mxu0 %vm89_vm0, %v216_v41  ;;  %v204_v45 = vmul.f32 %v6651_v22, %v190_v42 }
 0x140   :  { %v7576_v46 = vpop.eup %7575  ;;  %7026 = vmatprep.mubr.msk.f32.mxu0 %vm89_vm0, %v217_v43  ;;  %v205_v28 = vmul.f32 %v6651_v22, %v191_v44 }
 0x141   :  { %v7578_v21 = vpop.eup %7577  ;;  %v218_v47 = vadd.f32 %v6652_v26, %v204_v45  ;;  %v192_v50 = vmul.f32 %v7576_v46, %v7911_v39 }
 0x142   :  { %v219_v51 = vadd.f32 %v6652_v26, %v205_v28  ;;  %v193_v52 = vmul.f32 %v7578_v21, %v7919_v48  ;;  %v7773_v48 = vmov 0.0  }
 0x143   :  { %7027 = vmatmul.mubr.msk.f32.gmra.mrb[2].mxu0 %vm89_vm0, %v218_v47  ;;  %v206_v29 = vmul.f32 %v6651_v22, %v192_v50  ;;  %7035 = vmatprep.subr.mxu1 %v7773_v48 }
 0x144   :  { %v7580_v53 = vpop.eup %7579  ;;  %7029 = vmatprep.mubr.msk.f32.mxu0 %vm89_vm0, %v219_v51  ;;  %v207_v38 = vmul.f32 %v6651_v22, %v193_v52  ;;  %7060 = vmatprep.subr.mxu0 %v7773_v48 }
 0x145   :  { %v220_v54 = vadd.f32 %v6652_v26, %v206_v29  ;;  %v194_v55 = vmul.f32 %v7580_v53, %v7921_v49  ;;  %7037 = vmatprep.mubr.msk.f32.mxu1 %vm7774_vm1, %v7773_v48  ;;  %v6653_v49 = vld [vmem:[%s8973_s4] ss:$0 sm:$0xff]  ;;  %s7776_s4 = smov 64  }
 0x146   :  { %v221_v56 = vadd.f32 %v6652_v26, %v207_v38 }
 0x147   :  { %7030 = vmatmul.mubr.msk.f32.gmra.mrb[4].mxu0 %vm89_vm0, %v220_v54  ;;  %v208_v57 = vmul.f32 %v6651_v22, %v194_v55 }
 0x148   :  { %7032 = vmatprep.mubr.msk.f32.mxu0 %vm89_vm0, %v221_v56 }
 0x149   :  { %v222_v39 = vadd.f32 %v6652_v26, %v208_v57 }
 0x14b   :  { %7033 = vmatmul.mubr.msk.f32.gmra.mrb[6].mxu0 %vm89_vm0, %v222_v39 }
 0x14c   :  { %7062 = vmatprep.mubr.msk.f32.mxu0 %vm7774_vm1, %v7773_v48 }
 0x212   :  { %v7025_v58 = vpop.f32.mrb[0].mxu0 }
 0x213   :  { %v7974_v59 = vadd.f32 %v7025_v58, %v6653_v49  ;;  %v319_v60 = vpop.f32.mrb[1].mxu0 }
 0x214   :  { %v7976_v61 = vadd.f32 %v6653_v49, %v319_v60 }
 0x215   :  { %446 = vrot.lane.b32.xlu1 %v7974_v59, %s7775_s18  ;;  %v8013_v14 = vmul.f32 0.35355338, %v7974_v59 }
 0x216   :  { %v7028_v62 = vpop.f32.mrb[2].mxu0  ;;  %367 = vrot.lane.b32.xlu0 %v7976_v61, %s7775_s18  ;;  %v8004_v12 = vmul.f32 0.35355338, %v7976_v61 }
 0x217   :  { %v329_v63 = vpop.f32.mrb[3].mxu0  ;;  %v7983_v3 = vadd.f32 %v7028_v62, %v6653_v49 }
 0x218   :  { %v7980_v0 = vadd.f32 %v6653_v49, %v329_v63 }
 0x219   :  { %v8036_v22 = vmul.f32 0.35355338, %v7983_v3 }
 0x21a   :  { %v7031_v1 = vpop.f32.mrb[4].mxu0  ;;  %524 = vrot.lane.b32.xlu1 %v7980_v0, %s7775_s18  ;;  %v8022_v16 = vmul.f32 0.35355338, %v7980_v0 }
 0x21b   :  { %v339_v2 = vpop.f32.mrb[5].mxu0  ;;  %v7989_v7 = vadd.f32 %v7031_v1, %v6653_v49 }
 0x21c   :  { %v7985_v4 = vadd.f32 %v6653_v49, %v339_v2 }
 0x21d   :  { %v8032_v19 = vmul.f32 0.35355338, %v7989_v7 }
 0x21e   :  { %v7034_v5 = vpop.f32.mrb[6].mxu0  ;;  %602 = vrot.lane.b32.xlu1 %v7983_v3, %s7775_s18  ;;  %680 = vrot.lane.b32.xlu0 %v7985_v4, %s7775_s18  ;;  %v8053_v26 = vmul.f32 0.35355338, %v7985_v4 }
 0x21f   :  { %v349_v6 = vpop.f32.mrb[7].mxu0  ;;  %v7995_v9 = vadd.f32 %v7034_v5, %v6653_v49 }
 0x220   :  { %v7991_v8 = vadd.f32 %v6653_v49, %v349_v6 }
 0x221   :  { %v8050_v25 = vmul.f32 0.35355338, %v7995_v9 }
 0x222   :  { %758 = vrot.lane.b32.xlu1 %v7989_v7, %s7775_s18  ;;  %836 = vrot.lane.b32.xlu0 %v7991_v8, %s7775_s18  ;;  %v8065_v30 = vmul.f32 0.35355338, %v7991_v8 }
 0x226   :  { %914 = vrot.lane.b32.xlu1 %v7995_v9, %s7775_s18  ;;  %1079 = vrot.lane.b32.xlu0 %v7976_v61, %s7776_s4 }
 0x22a   :  { %1155 = vrot.lane.b32.xlu1 %v7974_v59, %s7776_s4 }
 0x287   :  { %v447_v10 = vpop.permute.xlu1 %446 }
 0x288   :  { %v368_v11 = vpop.permute.xlu0 %367 }
 0x289   :  { %7036 = vmatpush3.xpose.msk.msra.mxu1 %vm369_vm2, %v368_v11 }
 0x28a   :  { %7040 = vmatprep.subr.mxu1 %v7773_v48 }
 0x28c   :  { %v525_v13 = vpop.permute.xlu1 %524  ;;  %7038 = vmatmul.mubr.msk.f32.vlgmr.msra.gmra.mrb[0].mxu1 %vm369_vm2, %v8004_v12 }
 0x28d   :  { %7041 = vmatpush3.xpose.msk.msra.mxu1 %vm369_vm2, %v447_v10  ;;  %7042 = vmatprep.mubr.msk.f32.mxu1 %vm7774_vm1, %v7773_v48 }
 0x28e   :  { %7045 = vmatprep.subr.mxu1 %v7773_v48 }
 0x290   :  { %v603_v15 = vpop.permute.xlu1 %602  ;;  %7043 = vmatmul.mubr.msk.f32.vlgmr.msra.gmra.mrb[2].mxu1 %vm369_vm2, %v8013_v14  ;;  %v681_v17 = vpop.permute.xlu0 %680 }
 0x291   :  { %7046 = vmatpush3.xpose.msk.msra.mxu1 %vm369_vm2, %v525_v13  ;;  %7047 = vmatprep.mubr.msk.f32.mxu1 %vm7774_vm1, %v7773_v48 }
 0x292   :  { %7050 = vmatprep.subr.mxu1 %v7773_v48 }
 0x294   :  { %v759_v18 = vpop.permute.xlu1 %758  ;;  %7048 = vmatmul.mubr.msk.f32.vlgmr.msra.gmra.mrb[4].mxu1 %vm369_vm2, %v8022_v16  ;;  %v837_v24 = vpop.permute.xlu0 %836 }
 0x295   :  { %7051 = vmatpush3.xpose.msk.msra.mxu1 %vm369_vm2, %v603_v15  ;;  %7061 = vmatpush3.xpose.msk.msra.mxu0 %vm369_vm2, %v759_v18 }
 0x296   :  { %7052 = vmatprep.mubr.msk.f32.mxu1 %vm7774_vm1, %v7773_v48  ;;  %7070 = vmatprep.subr.mxu0 %v7773_v48 }
 0x297   :  { %7055 = vmatprep.subr.mxu1 %v7773_v48 }
 0x298   :  { %7063 = vmatmul.mubr.msk.f32.vlgmr.msra.gmra.mrb[8].mxu0 %vm369_vm2, %v8032_v19  ;;  %v915_v23 = vpop.permute.xlu1 %914  ;;  %7053 = vmatmul.mubr.msk.f32.vlgmr.msra.gmra.mrb[6].mxu1 %vm369_vm2, %v8036_v22  ;;  %v1080_v31 = vpop.permute.xlu0 %1079 }
 0x299   :  { %7056 = vmatpush3.xpose.msk.msra.mxu1 %vm369_vm2, %v681_v17  ;;  %7071 = vmatpush3.xpose.msk.msra.mxu0 %vm369_vm2, %v915_v23 }
 0x29a   :  { %7057 = vmatprep.mubr.msk.f32.mxu1 %vm7774_vm1, %v7773_v48  ;;  %7072 = vmatprep.mubr.msk.f32.mxu0 %vm7774_vm1, %v7773_v48 }
 0x29b   :  { %7080 = vmatprep.subr.mxu0 %v7773_v48  ;;  %7065 = vmatprep.subr.mxu1 %v7773_v48 }
 0x29c   :  { %7073 = vmatmul.mubr.msk.f32.vlgmr.msra.gmra.mrb[10].mxu0 %vm369_vm2, %v8050_v25  ;;  %v1156_v27 = vpop.permute.xlu1 %1155  ;;  %7058 = vmatmul.mubr.msk.f32.vlgmr.msra.gmra.mrb[8].mxu1 %vm369_vm2, %v8053_v26 }
 0x29d   :  { %7066 = vmatpush3.xpose.msk.msra.mxu1 %vm369_vm2, %v837_v24  ;;  %7081 = vmatpush3.msra.mxu0 %v1156_v27 }
 0x29e   :  { %7067 = vmatprep.mubr.msk.f32.mxu1 %vm7774_vm1, %v7773_v48  ;;  %7075 = vmatprep.subr.mxu1 %v7773_v48 }
 0x29f   :  { %7082 = vmatprep.mubr.msk.f32.mxu0 %vm7774_vm1, %v7773_v48  ;;  %7090 = vmatprep.subr.mxu0 %v7773_v48 }
 0x2a0   :  { %7068 = vmatmul.mubr.msk.f32.vlgmr.msra.gmra.mrb[10].mxu1 %vm369_vm2, %v8065_v30 }
 0x2a1   :  { %7076 = vmatpush3.msra.mxu1 %v1080_v31  ;;  %7077 = vmatprep.mubr.msk.f32.mxu1 %vm7774_vm1, %v7773_v48 }
 0x2a2   :  { %7085 = vmatprep.subr.mxu1 %v7773_v48 }
 0x35f   :  { %v441_v32 = vpop.f32.mrb[0].mxu1 }
 0x360   :  { %v7039_v33 = vpop.f32.mrb[1].mxu1  ;;  %v991_v34 = vsel %vm369_vm2, %v441_v32, -inf }
 0x361   :  { %992 = vmax.xlane.f32.xlu0 %v991_v34 }
 0x363   :  { %v519_v35 = vpop.f32.mrb[2].mxu1 }
 0x364   :  { %v7044_v20 = vpop.f32.mrb[3].mxu1  ;;  %v994_v36 = vsel %vm369_vm2, %v519_v35, -inf }
 0x365   :  { %995 = vmax.xlane.f32.xlu1 %v994_v36 }
 0x367   :  { %v597_v37 = vpop.f32.mrb[4].mxu1 }
 0x368   :  { %v7049_v40 = vpop.f32.mrb[5].mxu1  ;;  %v997_v41 = vsel %vm369_vm2, %v597_v37, -inf }
 0x369   :  { %998 = vmax.xlane.f32.xlu0 %v997_v41 }
 0x36b   :  { %v8079_v42 = vpop.f32.mrb[6].mxu1  ;;  %v831_v43 = vpop.f32.mrb[8].mxu0 }
 0x36c   :  { %v7054_v44 = vpop.f32.mrb[7].mxu1  ;;  %v7064_v45 = vpop.f32.mrb[9].mxu0  ;;  %v1006_v52 = vsel %vm369_vm2, %v831_v43, -inf  ;;  %v1000_v53 = vsel %vm369_vm2, %v8079_v42, -inf }
 0x36f   :  { %v8081_v46 = vpop.f32.mrb[8].mxu1  ;;  %v987_v28 = vpop.f32.mrb[10].mxu0 }
 0x370   :  { %v7059_v21 = vpop.f32.mrb[9].mxu1  ;;  %v7074_v47 = vpop.f32.mrb[11].mxu0  ;;  %v1012_v29 = vsel %vm369_vm2, %v987_v28, -inf  ;;  %v1003_v38 = vsel %vm369_vm2, %v8081_v46, -inf }
 0x373   :  { %v8083_v50 = vpop.f32.mrb[10].mxu1 }
 0x374   :  { %v7069_v51 = vpop.f32.mrb[11].mxu1  ;;  %v1009_v54 = vsel %vm369_vm2, %v8083_v50, -inf }
 0x376   :  { %1231 = vrot.lane.b32.xlu1 %v7980_v0, %s7776_s4 }
 0x37f   :  { %1383 = vrot.lane.b32.xlu0 %v7985_v4, %s7776_s4 }
 0x383   :  { %1535 = vrot.lane.b32.xlu0 %v7991_v8, %s7776_s4 }
 0x387   :  { %1689 = vrot.lane.b32.xlu0 %v7976_v61, %s7777_s19 }
 0x39a   :  { %1007 = vmax.xlane.f32.xlu1 %v1006_v52 }
 0x39e   :  { %1013 = vmax.xlane.f32.xlu1 %v1012_v29 }
 0x3a6   :  { %1001 = vmax.xlane.f32.xlu0 %v1000_v53 }
 0x3aa   :  { %1004 = vmax.xlane.f32.xlu0 %v1003_v38 }
 0x3ae   :  { %1010 = vmax.xlane.f32.xlu0 %v1009_v54 }
 0x3af   :  { %1307 = vrot.lane.b32.xlu1 %v7983_v3, %s7776_s4 }
 0x3b3   :  { %1459 = vrot.lane.b32.xlu1 %v7989_v7, %s7776_s4 }
 0x3b7   :  { %1611 = vrot.lane.b32.xlu1 %v7995_v9, %s7776_s4 }
 0x3bb   :  { %1767 = vrot.lane.b32.xlu1 %v7974_v59, %s7777_s19 }
 0x3c4   :  { %1687 = vrot.lane.b32.xlu0 %v8004_v12, %s7778_s20 }
 0x3ee   :  { %v993_v55 = vpop.xlane.xlu0 %992 }
 0x3ef   :  { %v1015_v56 = vsub.f32 %v441_v32, %v993_v55 }
 0x3f1   :  { %v1023_v57 = vmul.f32 1.442695, %v1015_v56 }
 0x3f2   :  { %v996_v39 = vpop.xlane.xlu1 %995 }
 0x3f3   :  { %7581 = vpow2.f32 %v1023_v57  ;;  %v1016_v49 = vsub.f32 %v519_v35, %v996_v39 }
 0x3f5   :  { %v1025_v58 = vmul.f32 1.442695, %v1016_v49 }
 0x3f6   :  { %v999_v60 = vpop.xlane.xlu0 %998  ;;  %v1232_v13 = vpop.permute.xlu1 %1231 }
 0x3f7   :  { %7583 = vpow2.f32 %v1025_v58  ;;  %v1017_v62 = vsub.f32 %v597_v37, %v999_v60 }
 0x3f9   :  { %v1027_v63 = vmul.f32 1.442695, %v1017_v62 }
 0x3fa   :  { %v8123_v15 = vpop.permute.xlu0 %1383 }
 0x3fb   :  { %7585 = vpow2.f32 %v1027_v63 }
 0x3fd   :  { %v8111_v1 = vpop.eup %7581 }
 0x3fe   :  { %v1039_v2 = vsel %vm369_vm2, %v8111_v1, 0.0  ;;  %v8125_v23 = vpop.permute.xlu0 %1535 }
 0x3ff   :  { %1040 = vadd.xlane.f32.xlu0 %v1039_v2 }
 0x401   :  { %v8115_v5 = vpop.eup %7583 }
 0x402   :  { %v1042_v6 = vsel %vm369_vm2, %v8115_v5, 0.0  ;;  %v8127_v33 = vpop.permute.xlu0 %1689 }
 0x403   :  { %1043 = vadd.xlane.f32.xlu1 %v1042_v6 }
 0x405   :  { %v8119_v10 = vpop.eup %7585 }
 0x406   :  { %v1045_v11 = vsel %vm369_vm2, %v8119_v10, 0.0 }
 0x407   :  { %1046 = vadd.xlane.f32.xlu0 %v1045_v11 }
 0x427   :  { %v1008_v17 = vpop.xlane.xlu1 %1007 }
 0x428   :  { %v1020_v18 = vsub.f32 %v831_v43, %v1008_v17 }
 0x42a   :  { %v1033_v24 = vmul.f32 1.442695, %v1020_v18 }
 0x42b   :  { %v1014_v27 = vpop.xlane.xlu1 %1013 }
 0x42c   :  { %7587 = vpow2.f32 %v1033_v24  ;;  %v1022_v31 = vsub.f32 %v987_v28, %v1014_v27 }
 0x42e   :  { %v1037_v32 = vmul.f32 1.442695, %v1022_v31 }
 0x42f   :  { %v1308_v53 = vpop.permute.xlu1 %1307 }
 0x430   :  { %7589 = vpow2.f32 %v1037_v32 }
 0x433   :  { %v1002_v34 = vpop.xlane.xlu0 %1001  ;;  %v1460_v54 = vpop.permute.xlu1 %1459 }
 0x434   :  { %v1018_v35 = vsub.f32 %v8079_v42, %v1002_v34 }
 0x436   :  { %v8130_v20 = vpop.eup %7587  ;;  %v1029_v36 = vmul.f32 1.442695, %v1018_v35 }
 0x437   :  { %v1005_v37 = vpop.xlane.xlu0 %1004  ;;  %v1054_v40 = vsel %vm369_vm2, %v8130_v20, 0.0  ;;  %v1612_v55 = vpop.permute.xlu1 %1611 }
 0x438   :  { %7591 = vpow2.f32 %v1029_v36  ;;  %v1019_v41 = vsub.f32 %v8081_v46, %v1005_v37  ;;  %1055 = vadd.xlane.f32.xlu1 %v1054_v40 }
 0x43a   :  { %v8135_v43 = vpop.eup %7589  ;;  %v1031_v44 = vmul.f32 1.442695, %v1019_v41 }
 0x43b   :  { %v1060_v45 = vsel %vm369_vm2, %v8135_v43, 0.0  ;;  %v1011_v47 = vpop.xlane.xlu0 %1010  ;;  %v1768_v57 = vpop.permute.xlu1 %1767 }
 0x43c   :  { %7593 = vpow2.f32 %v1031_v44  ;;  %1061 = vadd.xlane.f32.xlu1 %v1060_v45  ;;  %v1021_v51 = vsub.f32 %v8083_v50, %v1011_v47 }
 0x43e   :  { %v1035_v52 = vmul.f32 1.442695, %v1021_v51 }
 0x43f   :  { %v8166_v56 = vpop.permute.xlu0 %1687 }
 0x440   :  { %7595 = vpow2.f32 %v1035_v52 }
 0x442   :  { %v8139_v42 = vpop.eup %7591 }
 0x443   :  { %v1048_v28 = vsel %vm369_vm2, %v8139_v42, 0.0 }
 0x444   :  { %1049 = vadd.xlane.f32.xlu1 %v1048_v28 }
 0x446   :  { %v8143_v21 = vpop.eup %7593 }
 0x447   :  { %v1051_v46 = vsel %vm369_vm2, %v8143_v21, 0.0 }
 0x448   :  { %1052 = vadd.xlane.f32.xlu0 %v1051_v46 }
 0x44a   :  { %v8162_v29 = vpop.eup %7595 }
 0x44b   :  { %v1057_v38 = vsel %vm369_vm2, %v8162_v29, 0.0 }
 0x455   :  { %1765 = vrot.lane.b32.xlu1 %v8013_v14, %s7778_s20 }
 0x459   :  { %1923 = vrot.lane.b32.xlu1 %v7983_v3, %s7777_s19 }
 0x45d   :  { %1921 = vrot.lane.b32.xlu1 %v8036_v22, %s7778_s20 }
 0x45e   :  { %1845 = vrot.lane.b32.xlu0 %v7980_v0, %s7777_s19 }
 0x461   :  { %2079 = vrot.lane.b32.xlu1 %v7989_v7, %s7777_s19 }
 0x465   :  { %2077 = vrot.lane.b32.xlu1 %v8032_v19, %s7778_s20 }
 0x469   :  { %2233 = vrot.lane.b32.xlu1 %v8050_v25, %s7778_s20 }
 0x47d   :  { %1058 = vadd.xlane.f32.xlu0 %v1057_v38 }
 0x48c   :  { %v1041_v39 = vpop.xlane.xlu0 %1040 }
 0x48d   :  { %7597 = vrcp.f32 %v1041_v39 }
 0x490   :  { %v1044_v50 = vpop.xlane.xlu1 %1043 }
 0x491   :  { %7599 = vrcp.f32 %v1044_v50 }
 0x493   :  { %1843 = vrot.lane.b32.xlu0 %v8022_v16, %s7778_s20 }
 0x494   :  { %v1047_v49 = vpop.xlane.xlu0 %1046 }
 0x495   :  { %7601 = vrcp.f32 %v1047_v49 }
 0x497   :  { %v7598_v58 = vpop.eup %7597  ;;  %2001 = vrot.lane.b32.xlu0 %v7985_v4, %s7777_s19 }
 0x498   :  { %v1071_v60 = vmul.f32 %v7598_v58, %v8111_v1 }
 0x49a   :  { %7078 = vmatmul.mubr.msk.f32.vlgmr.msra.gmra.mrb[12].mxu1 %vm369_vm2, %v1071_v60 }
 0x49b   :  { %v7600_v62 = vpop.eup %7599  ;;  %7086 = vmatpush3.msra.mxu1 %v1232_v13  ;;  %1999 = vrot.lane.b32.xlu0 %v8053_v26, %s7778_s20 }
 0x49c   :  { %v1072_v63 = vmul.f32 %v7600_v62, %v8115_v5  ;;  %7087 = vmatprep.mubr.msk.f32.mxu1 %vm7774_vm1, %v7773_v48  ;;  %7095 = vmatprep.subr.mxu1 %v7773_v48 }
 0x49e   :  { %7083 = vmatmul.mubr.msk.f32.vlgmr.msra.gmra.mrb[12].mxu0 %vm369_vm2, %v1072_v63 }
 0x49f   :  { %v7602_v2 = vpop.eup %7601  ;;  %7091 = vmatpush3.msra.mxu0 %v1308_v53  ;;  %2235 = vrot.lane.b32.xlu0 %v7995_v9, %s7777_s19 }
 0x4a0   :  { %v1073_v1 = vmul.f32 %v7602_v2, %v8119_v10  ;;  %7092 = vmatprep.mubr.msk.f32.mxu0 %vm7774_vm1, %v7773_v48  ;;  %7100 = vmatprep.subr.mxu0 %v7773_v48 }
 0x4a2   :  { %7088 = vmatmul.mubr.msk.f32.vlgmr.msra.gmra.mrb[14].mxu1 %vm369_vm2, %v1073_v1 }
 0x4a3   :  { %7096 = vmatpush3.msra.mxu1 %v8123_v15  ;;  %7097 = vmatprep.mubr.msk.f32.mxu1 %vm7774_vm1, %v7773_v48 }
 0x4a4   :  { %7105 = vmatprep.subr.mxu1 %v7773_v48 }
 0x4c5   :  { %v1056_v5 = vpop.xlane.xlu1 %1055 }
 0x4c9   :  { %v1062_v6 = vpop.xlane.xlu1 %1061 }
 0x4d1   :  { %v1050_v11 = vpop.xlane.xlu1 %1049 }
 0x4d2   :  { %7603 = vrcp.f32 %v1050_v11 }
 0x4d3   :  { %7605 = vrcp.f32 %v1056_v5 }
 0x4d5   :  { %v1053_v10 = vpop.xlane.xlu0 %1052  ;;  %v1766_v17 = vpop.permute.xlu1 %1765 }
 0x4d6   :  { %7607 = vrcp.f32 %v1053_v10 }
 0x4d7   :  { %7609 = vrcp.f32 %v1062_v6 }
 0x4d9   :  { %v1924_v34 = vpop.permute.xlu1 %1923  ;;  %v1846_v37 = vpop.permute.xlu0 %1845 }
 0x4dc   :  { %v7604_v13 = vpop.eup %7603 }
 0x4dd   :  { %v1074_v18 = vmul.f32 %v7604_v13, %v8139_v42  ;;  %v7606_v24 = vpop.eup %7605 }
 0x4de   :  { %v1076_v31 = vmul.f32 %v7606_v24, %v8130_v20  ;;  %v1922_v20 = vpop.permute.xlu1 %1921 }
 0x4df   :  { %7093 = vmatmul.mubr.msk.f32.vlgmr.msra.gmra.mrb[14].mxu0 %vm369_vm2, %v1074_v18 }
 0x4e0   :  { %v7608_v15 = vpop.eup %7607  ;;  %7101 = vmatpush3.msra.mxu0 %v1460_v54  ;;  %7102 = vmatprep.mubr.msk.f32.mxu0 %vm7774_vm1, %v7773_v48 }
 0x4e1   :  { %7110 = vmatprep.subr.mxu0 %v7773_v48  ;;  %v1075_v27 = vmul.f32 %v7608_v15, %v8143_v21  ;;  %v7610_v32 = vpop.eup %7609 }
 0x4e2   :  { %v1078_v35 = vmul.f32 %v7610_v32, %v8135_v43 }
 0x4e3   :  { %7098 = vmatmul.mubr.msk.f32.vlgmr.msra.gmra.mrb[16].mxu1 %vm369_vm2, %v1075_v27  ;;  %7103 = vmatmul.mubr.msk.f32.vlgmr.msra.gmra.mrb[16].mxu0 %vm369_vm2, %v1076_v31 }
 0x4e4   :  { %7106 = vmatpush3.msra.mxu1 %v8125_v23  ;;  %7111 = vmatpush3.msra.mxu0 %v1612_v55  ;;  %v2080_v23 = vpop.permute.xlu1 %2079 }
 0x4e5   :  { %7112 = vmatprep.mubr.msk.f32.mxu0 %vm7774_vm1, %v7773_v48  ;;  %7120 = vmatprep.subr.mxu0 %v7773_v48 }
 0x4e6   :  { %7107 = vmatprep.mubr.msk.f32.mxu1 %vm7774_vm1, %v7773_v48  ;;  %7115 = vmatprep.subr.mxu1 %v7773_v48 }
 0x4e7   :  { %7113 = vmatmul.mubr.msk.f32.vlgmr.msra.gmra.mrb[18].mxu0 %vm369_vm2, %v1078_v35 }
 0x4e8   :  { %7122 = vmatprep.mubr.msk.f32.mxu0 %vm7774_vm1, %v7773_v48  ;;  %v2078_v36 = vpop.permute.xlu1 %2077 }
 0x4eb   :  { %7121 = vmatpush3.xpose.msk.msra.mxu0 %vm369_vm2, %v1768_v57 }
 0x4ec   :  { %7130 = vmatprep.subr.mxu0 %v7773_v48  ;;  %v2234_v21 = vpop.permute.xlu1 %2233 }
 0x4ee   :  { %7123 = vmatmul.mubr.msk.f32.vlgmr.msra.gmra.mrb[20].mxu0 %vm369_vm2, %v1766_v17 }
 0x4ef   :  { %7131 = vmatpush3.xpose.msk.msra.mxu0 %vm369_vm2, %v1924_v34  ;;  %7132 = vmatprep.mubr.msk.f32.mxu0 %vm7774_vm1, %v7773_v48 }
 0x4f0   :  { %7140 = vmatprep.subr.mxu0 %v7773_v48 }
 0x4f2   :  { %7133 = vmatmul.mubr.msk.f32.vlgmr.msra.gmra.mrb[22].mxu0 %vm369_vm2, %v1922_v20 }
 0x4f3   :  { %7141 = vmatpush3.xpose.msk.msra.mxu0 %vm369_vm2, %v2080_v23  ;;  %7142 = vmatprep.mubr.msk.f32.mxu0 %vm7774_vm1, %v7773_v48 }
 0x4f4   :  { %7150 = vmatprep.subr.mxu0 %v7773_v48 }
 0x4f6   :  { %7143 = vmatmul.mubr.msk.f32.vlgmr.msra.gmra.mrb[24].mxu0 %vm369_vm2, %v2078_v36 }
 0x4f7   :  { %7152 = vmatprep.mubr.msk.f32.mxu0 %vm7774_vm1, %v7773_v48 }
 0x50a   :  { %v1059_v40 = vpop.xlane.xlu0 %1058 }
 0x50b   :  { %7611 = vrcp.f32 %v1059_v40 }
 0x50e   :  { %v1844_v41 = vpop.permute.xlu0 %1843 }
 0x512   :  { %v2002_v43 = vpop.permute.xlu0 %2001 }
 0x515   :  { %v7612_v44 = vpop.eup %7611 }
 0x516   :  { %v2000_v45 = vpop.permute.xlu0 %1999  ;;  %v1077_v42 = vmul.f32 %v7612_v44, %v8162_v29 }
 0x518   :  { %7108 = vmatmul.mubr.msk.f32.vlgmr.msra.gmra.mrb[18].mxu1 %vm369_vm2, %v1077_v42 }
 0x519   :  { %7116 = vmatpush3.xpose.msk.msra.mxu1 %vm369_vm2, %v8127_v33  ;;  %7117 = vmatprep.mubr.msk.f32.mxu1 %vm7774_vm1, %v7773_v48 }
 0x51a   :  { %v2236_v28 = vpop.permute.xlu0 %2235  ;;  %7125 = vmatprep.subr.mxu1 %v7773_v48 }
 0x51b   :  { %7151 = vmatpush3.xpose.msk.msra.mxu0 %vm369_vm2, %v2236_v28 }
 0x51c   :  { %7118 = vmatmul.mubr.msk.f32.vlgmr.msra.gmra.mrb[20].mxu1 %vm369_vm2, %v8166_v56  ;;  %7160 = vmatprep.subr.mxu0 %v7773_v48 }
 0x51d   :  { %7126 = vmatpush3.xpose.msk.msra.mxu1 %vm369_vm2, %v1846_v37  ;;  %7127 = vmatprep.mubr.msk.f32.mxu1 %vm7774_vm1, %v7773_v48 }
 0x51e   :  { %7153 = vmatmul.mubr.msk.f32.vlgmr.msra.gmra.mrb[26].mxu0 %vm369_vm2, %v2234_v21  ;;  %7135 = vmatprep.subr.mxu1 %v7773_v48 }
 0x51f   :  { %7162 = vmatprep.mubr.msk.f32.mxu0 %vm7774_vm1, %v7773_v48 }
 0x520   :  { %7128 = vmatmul.mubr.msk.f32.vlgmr.msra.gmra.mrb[22].mxu1 %vm369_vm2, %v1844_v41 }
 0x521   :  { %7136 = vmatpush3.xpose.msk.msra.mxu1 %vm369_vm2, %v2002_v43  ;;  %7137 = vmatprep.mubr.msk.f32.mxu1 %vm7774_vm1, %v7773_v48 }
 0x522   :  { %7145 = vmatprep.subr.mxu1 %v7773_v48 }
 0x524   :  { %7138 = vmatmul.mubr.msk.f32.vlgmr.msra.gmra.mrb[24].mxu1 %vm369_vm2, %v2000_v45 }
 0x525   :  { %7147 = vmatprep.mubr.msk.f32.mxu1 %vm7774_vm1, %v7773_v48 }
 0x56d   :  { %v8253_v33 = vpop.f32.mrb[12].mxu1 }
 0x56e   :  { %v7079_v46 = vpop.f32.mrb[13].mxu1 }
 0x571   :  { %v8255_v47 = vpop.f32.mrb[12].mxu0 }
 0x572   :  { %v7084_v51 = vpop.f32.mrb[13].mxu0 }
 0x575   :  { %v8257_v52 = vpop.f32.mrb[14].mxu1 }
 0x576   :  { %v7089_v29 = vpop.f32.mrb[15].mxu1 }
 0x5b2   :  { %v8259_v53 = vpop.f32.mrb[14].mxu0 }
 0x5b3   :  { %v7094_v38 = vpop.f32.mrb[15].mxu0 }
 0x5b6   :  { %v8261_v54 = vpop.f32.mrb[16].mxu1  ;;  %v8263_v55 = vpop.f32.mrb[16].mxu0 }
 0x5b7   :  { %v7099_v56 = vpop.f32.mrb[17].mxu1  ;;  %v7104_v57 = vpop.f32.mrb[17].mxu0 }
 0x5ba   :  { %v8265_v39 = vpop.f32.mrb[18].mxu0 }
 0x5bb   :  { %v7114_v50 = vpop.f32.mrb[19].mxu0 }
 0x5c1   :  { %v1839_v49 = vpop.f32.mrb[20].mxu0 }
 0x5c2   :  { %v7124_v58 = vpop.f32.mrb[21].mxu0  ;;  %v2314_v60 = vsel %vm369_vm2, %v1839_v49, -inf }
 0x5c3   :  { %2315 = vmax.xlane.f32.xlu1 %v2314_v60 }
 0x5c5   :  { %v1995_v62 = vpop.f32.mrb[22].mxu0 }
 0x5c6   :  { %v7134_v63 = vpop.f32.mrb[23].mxu0  ;;  %v2320_v35 = vsel %vm369_vm2, %v1995_v62, -inf }
 0x5c9   :  { %v2151_v2 = vpop.f32.mrb[24].mxu0 }
 0x5ca   :  { %v7144_v1 = vpop.f32.mrb[25].mxu0  ;;  %v2326_v5 = vsel %vm369_vm2, %v2151_v2, -inf }
 0x5cb   :  { %2327 = vmax.xlane.f32.xlu1 %v2326_v5 }
 0x5dc   :  { %2155 = vrot.lane.b32.xlu1 %v8065_v30, %s7778_s20 }
 0x5e0   :  { %2399 = vrot.lane.b32.xlu1 %v7976_v61, %s7779_s21 }
 0x5e4   :  { %2475 = vrot.lane.b32.xlu1 %v7974_v59, %s7779_s21 }
 0x5e8   :  { %2627 = vrot.lane.b32.xlu1 %v7983_v3, %s7779_s21 }
 0x5eb   :  { %v8277_v6 = vpop.f32.mrb[18].mxu1 }
 0x5ec   :  { %v7109_v11 = vpop.f32.mrb[19].mxu1 }
 0x5ef   :  { %v1761_v10 = vpop.f32.mrb[20].mxu1 }
 0x5f0   :  { %v7119_v13 = vpop.f32.mrb[21].mxu1  ;;  %v2311_v17 = vsel %vm369_vm2, %v1761_v10, -inf }
 0x5f1   :  { %v8280_v18 = vpop.f32.mrb[26].mxu0  ;;  %2312 = vmax.xlane.f32.xlu0 %v2311_v17 }
 0x5f2   :  { %v7154_v24 = vpop.f32.mrb[27].mxu0 }
 0x5f3   :  { %v1917_v15 = vpop.f32.mrb[22].mxu1 }
 0x5f4   :  { %v7129_v27 = vpop.f32.mrb[23].mxu1  ;;  %v2317_v31 = vsel %vm369_vm2, %v1917_v15, -inf }
 0x5f5   :  { %2318 = vmax.xlane.f32.xlu0 %v2317_v31 }
 0x5f7   :  { %v2073_v32 = vpop.f32.mrb[24].mxu1 }
 0x5f8   :  { %v7139_v34 = vpop.f32.mrb[25].mxu1  ;;  %v2323_v20 = vsel %vm369_vm2, %v2073_v32, -inf }
 0x5f9   :  { %2321 = vmax.xlane.f32.xlu0 %v2320_v35 }
 0x5fd   :  { %2324 = vmax.xlane.f32.xlu0 %v2323_v20 }
 0x613   :  { %2157 = vrot.lane.b32.xlu0 %v7991_v8, %s7777_s19 }
 0x617   :  { %2551 = vrot.lane.b32.xlu0 %v7980_v0, %s7779_s21 }
 0x650   :  { %v2316_v23 = vpop.xlane.xlu1 %2315 }
 0x651   :  { %v2336_v36 = vsub.f32 %v1839_v49, %v2316_v23 }
 0x653   :  { %v2345_v37 = vmul.f32 1.442695, %v2336_v36 }
 0x655   :  { %7613 = vpow2.f32 %v2345_v37 }
 0x658   :  { %v2328_v40 = vpop.xlane.xlu1 %2327 }
 0x659   :  { %v2340_v38 = vsub.f32 %v2151_v2, %v2328_v40 }
 0x65b   :  { %v2353_v49 = vmul.f32 1.442695, %v2340_v38 }
 0x65c   :  { %v2156_v41 = vpop.permute.xlu1 %2155 }
 0x65f   :  { %v8289_v43 = vpop.eup %7613 }
 0x660   :  { %v2400_v44 = vpop.permute.xlu1 %2399  ;;  %v2362_v45 = vsel %vm369_vm2, %v8289_v43, 0.0 }
 0x661   :  { %2363 = vadd.xlane.f32.xlu1 %v2362_v45 }
 0x664   :  { %v2476_v42 = vpop.permute.xlu1 %2475 }
 0x665   :  { %7161 = vmatpush3.msra.mxu0 %v2476_v42 }
 0x666   :  { %7170 = vmatprep.subr.mxu0 %v7773_v48 }
 0x668   :  { %v2628_v34 = vpop.permute.xlu1 %2627 }
 0x67e   :  { %v2313_v28 = vpop.xlane.xlu0 %2312 }
 0x67f   :  { %v2335_v21 = vsub.f32 %v1761_v10, %v2313_v28 }
 0x681   :  { %v2343_v46 = vmul.f32 1.442695, %v2335_v21 }
 0x682   :  { %v2319_v51 = vpop.xlane.xlu0 %2318 }
 0x683   :  { %7615 = vpow2.f32 %v2343_v46  ;;  %v2337_v29 = vsub.f32 %v1917_v15, %v2319_v51 }
 0x685   :  { %v2347_v56 = vmul.f32 1.442695, %v2337_v29 }
 0x686   :  { %v2322_v57 = vpop.xlane.xlu0 %2321 }
 0x687   :  { %7617 = vpow2.f32 %v2347_v56  ;;  %v2338_v50 = vsub.f32 %v1995_v62, %v2322_v57 }
 0x689   :  { %v2349_v58 = vmul.f32 1.442695, %v2338_v50 }
 0x68a   :  { %v2325_v60 = vpop.xlane.xlu0 %2324 }
 0x68b   :  { %7619 = vpow2.f32 %v2349_v58  ;;  %v2339_v63 = vsub.f32 %v2073_v32, %v2325_v60  ;;  %v2332_v32 = vsel %vm369_vm2, %v8280_v18, -inf }
 0x68c   :  { %7621 = vpow2.f32 %v2353_v49 }
 0x68d   :  { %v7616_v1 = vpop.eup %7615  ;;  %v2351_v5 = vmul.f32 1.442695, %v2339_v63 }
 0x68e   :  { %v2158_v11 = vpop.permute.xlu0 %2157  ;;  %v2359_v10 = vsel %vm369_vm2, %v7616_v1, 0.0 }
 0x68f   :  { %7623 = vpow2.f32 %v2351_v5  ;;  %2360 = vadd.xlane.f32.xlu0 %v2359_v10  ;;  %7146 = vmatpush3.xpose.msk.msra.mxu1 %vm369_vm2, %v2158_v11 }
 0x690   :  { %7155 = vmatprep.subr.mxu1 %v7773_v48 }
 0x691   :  { %v7618_v2 = vpop.eup %7617 }
 0x692   :  { %7148 = vmatmul.mubr.msk.f32.vlgmr.msra.gmra.mrb[26].mxu1 %vm369_vm2, %v2156_v41  ;;  %v2365_v62 = vsel %vm369_vm2, %v7618_v2, 0.0  ;;  %v2552_v36 = vpop.permute.xlu0 %2551 }
 0x693   :  { %2366 = vadd.xlane.f32.xlu0 %v2365_v62  ;;  %7156 = vmatpush3.msra.mxu1 %v2400_v44 }
 0x694   :  { %7157 = vmatprep.mubr.msk.f32.mxu1 %vm7774_vm1, %v7773_v48  ;;  %7165 = vmatprep.subr.mxu1 %v7773_v48 }
 0x695   :  { %v7620_v13 = vpop.eup %7619 }
 0x696   :  { %v2368_v17 = vsel %vm369_vm2, %v7620_v13, 0.0  ;;  %v7622_v24 = vpop.eup %7621 }
 0x697   :  { %2369 = vadd.xlane.f32.xlu1 %v2368_v17  ;;  %v2374_v27 = vsel %vm369_vm2, %v7622_v24, 0.0 }
 0x699   :  { %v7624_v15 = vpop.eup %7623 }
 0x69a   :  { %v2371_v31 = vsel %vm369_vm2, %v7624_v15, 0.0 }
 0x69b   :  { %2375 = vadd.xlane.f32.xlu1 %v2374_v27  ;;  %2372 = vadd.xlane.f32.xlu0 %v2371_v31 }
 0x6ac   :  { %2779 = vrot.lane.b32.xlu1 %v7989_v7, %s7779_s21 }
 0x6b1   :  { %2703 = vrot.lane.b32.xlu0 %v7985_v4, %s7779_s21 }
 0x6d0   :  { %2333 = vmax.xlane.f32.xlu0 %v2332_v32 }
 0x6e6   :  { %2931 = vrot.lane.b32.xlu0 %v7995_v9, %s7779_s21 }
 0x6ea   :  { %3265 = vrot.lane.b32.xlu0 %v8004_v12, %s7780_s22 }
 0x6ee   :  { %v2364_v35 = vpop.xlane.xlu1 %2363  ;;  %3343 = vrot.lane.b32.xlu0 %v8013_v14, %s7780_s22 }
 0x6ef   :  { %7625 = vrcp.f32 %v2364_v35 }
 0x6f2   :  { %3421 = vrot.lane.b32.xlu0 %v8022_v16, %s7780_s22 }
 0x6f6   :  { %3499 = vrot.lane.b32.xlu0 %v8036_v22, %s7780_s22 }
 0x6f9   :  { %v7626_v20 = vpop.eup %7625 }
 0x6fa   :  { %3577 = vrot.lane.b32.xlu0 %v8053_v26, %s7780_s22  ;;  %v2392_v23 = vmul.f32 %v7626_v20, %v8289_v43 }
 0x6fc   :  { %7163 = vmatmul.mubr.msk.f32.vlgmr.msra.gmra.mrb[28].mxu0 %vm369_vm2, %v2392_v23 }
 0x6fd   :  { %7171 = vmatpush3.msra.mxu0 %v2628_v34  ;;  %7172 = vmatprep.mubr.msk.f32.mxu0 %vm7774_vm1, %v7773_v48 }
 0x6fe   :  { %3655 = vrot.lane.b32.xlu0 %v8032_v19, %s7780_s22  ;;  %7180 = vmatprep.subr.mxu0 %v7773_v48 }
 0x702   :  { %3733 = vrot.lane.b32.xlu0 %v8065_v30, %s7780_s22 }
 0x706   :  { %3811 = vrot.lane.b32.xlu0 %v8050_v25, %s7780_s22 }
 0x71c   :  { %v2361_v37 = vpop.xlane.xlu0 %2360 }
 0x71d   :  { %7627 = vrcp.f32 %v2361_v37 }
 0x720   :  { %v2367_v40 = vpop.xlane.xlu0 %2366 }
 0x721   :  { %7629 = vrcp.f32 %v2367_v40 }
 0x724   :  { %v2370_v41 = vpop.xlane.xlu1 %2369 }
 0x725   :  { %7631 = vrcp.f32 %v2370_v41 }
 0x727   :  { %v7628_v43 = vpop.eup %7627 }
 0x728   :  { %v2376_v44 = vpop.xlane.xlu1 %2375  ;;  %v2373_v45 = vpop.xlane.xlu0 %2372  ;;  %v2391_v42 = vmul.f32 %v7628_v43, %v7616_v1 }
 0x729   :  { %7633 = vrcp.f32 %v2376_v44 }
 0x72a   :  { %7635 = vrcp.f32 %v2373_v45  ;;  %7158 = vmatmul.mubr.msk.f32.vlgmr.msra.gmra.mrb[28].mxu1 %vm369_vm2, %v2391_v42 }
 0x72b   :  { %v7630_v28 = vpop.eup %7629  ;;  %7166 = vmatpush3.msra.mxu1 %v2552_v36  ;;  %7167 = vmatprep.mubr.msk.f32.mxu1 %vm7774_vm1, %v7773_v48 }
 0x72c   :  { %v2393_v21 = vmul.f32 %v7630_v28, %v7618_v2  ;;  %v2704_v46 = vpop.permute.xlu0 %2703  ;;  %7175 = vmatprep.subr.mxu1 %v7773_v48  ;;  %v2780_v38 = vpop.permute.xlu1 %2779 }
 0x72e   :  { %7168 = vmatmul.mubr.msk.f32.vlgmr.msra.gmra.mrb[30].mxu1 %vm369_vm2, %v2393_v21 }
 0x72f   :  { %v7632_v51 = vpop.eup %7631  ;;  %7176 = vmatpush3.msra.mxu1 %v2704_v46  ;;  %7177 = vmatprep.mubr.msk.f32.mxu1 %vm7774_vm1, %v7773_v48 }
 0x730   :  { %v2394_v29 = vmul.f32 %v7632_v51, %v7620_v13  ;;  %7185 = vmatprep.subr.mxu1 %v7773_v48 }
 0x732   :  { %7173 = vmatmul.mubr.msk.f32.vlgmr.msra.gmra.mrb[30].mxu0 %vm369_vm2, %v2394_v29 }
 0x733   :  { %v7634_v56 = vpop.eup %7633  ;;  %7181 = vmatpush3.msra.mxu0 %v2780_v38  ;;  %7182 = vmatprep.mubr.msk.f32.mxu0 %vm7774_vm1, %v7773_v48 }
 0x734   :  { %v7636_v57 = vpop.eup %7635  ;;  %v2396_v50 = vmul.f32 %v7634_v56, %v7622_v24  ;;  %7190 = vmatprep.subr.mxu0 %v7773_v48 }
 0x735   :  { %v2395_v49 = vmul.f32 %v7636_v57, %v7624_v15 }
 0x736   :  { %7183 = vmatmul.mubr.msk.f32.vlgmr.msra.gmra.mrb[32].mxu0 %vm369_vm2, %v2396_v50 }
 0x737   :  { %7178 = vmatmul.mubr.msk.f32.vlgmr.msra.gmra.mrb[32].mxu1 %vm369_vm2, %v2395_v49  ;;  %7192 = vmatprep.mubr.msk.f32.mxu0 %vm7774_vm1, %v7773_v48 }
 0x738   :  { %7187 = vmatprep.mubr.msk.f32.mxu1 %vm7774_vm1, %v7773_v48 }
 0x75d   :  { %v2334_v58 = vpop.xlane.xlu0 %2333 }
 0x75e   :  { %v2342_v60 = vsub.f32 %v8280_v18, %v2334_v58  ;;  %v8354_v18 = vld [vmem:[%s8974_s5 + $0x8] sm:$0xff] }
 0x760   :  { %v2357_v63 = vmul.f32 1.442695, %v2342_v60 }
 0x761   :  { %v2932_v1 = vpop.permute.xlu0 %2931 }
 0x762   :  { %7637 = vpow2.f32 %v2357_v63  ;;  %7191 = vmatpush3.msra.mxu0 %v2932_v1 }
 0x763   :  { %7195 = vmatprep.subr.mxu0 %v8354_v18 }
 0x765   :  { %v8345_v5 = vpop.f32.mrb[26].mxu1  ;;  %v3266_v43 = vpop.permute.xlu0 %3265 }
 0x766   :  { %v7149_v11 = vpop.f32.mrb[27].mxu1  ;;  %v2329_v62 = vsel %vm369_vm2, %v8345_v5, -inf }
 0x769   :  { %v3344_v42 = vpop.permute.xlu0 %3343 }
 0x76c   :  { %v7638_v10 = vpop.eup %7637 }
 0x76d   :  { %v2380_v2 = vsel %vm369_vm2, %v7638_v10, 0.0  ;;  %v3422_v21 = vpop.permute.xlu0 %3421 }
 0x76e   :  { %2381 = vadd.xlane.f32.xlu1 %v2380_v2 }
 0x771   :  { %v3500_v51 = vpop.permute.xlu0 %3499 }
 0x775   :  { %v3578_v38 = vpop.permute.xlu0 %3577 }
 0x779   :  { %v3656_v57 = vpop.permute.xlu0 %3655 }
 0x77d   :  { %v3734_v49 = vpop.permute.xlu0 %3733 }
 0x77f   :  { %3267 = vrot.lane.b32.xlu1 %v7976_v61, %s7781_s23 }
 0x781   :  { %v3812_v60 = vpop.permute.xlu0 %3811 }
 0x783   :  { %3345 = vrot.lane.b32.xlu1 %v7974_v59, %s7781_s23 }
 0x787   :  { %3423 = vrot.lane.b32.xlu1 %v7980_v0, %s7781_s23 }
 0x78b   :  { %3501 = vrot.lane.b32.xlu1 %v7983_v3, %s7781_s23 }
 0x78f   :  { %3579 = vrot.lane.b32.xlu1 %v7985_v4, %s7781_s23 }
 0x793   :  { %3657 = vrot.lane.b32.xlu1 %v7989_v7, %s7781_s23 }
 0x797   :  { %3735 = vrot.lane.b32.xlu1 %v7991_v8, %s7781_s23 }
 0x79b   :  { %3813 = vrot.lane.b32.xlu1 %v7995_v9, %s7781_s23 }
 0x7bf   :  { %2330 = vmax.xlane.f32.xlu1 %v2329_v62 }
 0x7cf   :  { %v2547_v13 = vpop.f32.mrb[28].mxu0 }
 0x7d0   :  { %v7164_v17 = vpop.f32.mrb[29].mxu0 }
 0x7fb   :  { %v2382_v24 = vpop.xlane.xlu1 %2381 }
 0x7fc   :  { %7639 = vrcp.f32 %v2382_v24 }
 0x7fd   :  { %v2471_v15 = vpop.f32.mrb[28].mxu1 }
 0x7fe   :  { %v7159_v27 = vpop.f32.mrb[29].mxu1 }
 0x7ff   :  { %v3268_v36 = vpop.permute.xlu1 %3267 }
 0x801   :  { %v2623_v31 = vpop.f32.mrb[30].mxu1 }
 0x802   :  { %v7169_v32 = vpop.f32.mrb[31].mxu1 }
 0x803   :  { %v3346_v45 = vpop.permute.xlu1 %3345 }
 0x805   :  { %v2699_v34 = vpop.f32.mrb[30].mxu0 }
 0x806   :  { %v7640_v35 = vpop.eup %7639  ;;  %v7174_v20 = vpop.f32.mrb[31].mxu0 }
 0x807   :  { %v2398_v23 = vmul.f32 %v7640_v35, %v7638_v10  ;;  %v3424_v28 = vpop.permute.xlu1 %3423 }
 0x809   :  { %v2851_v37 = vpop.f32.mrb[32].mxu0  ;;  %7193 = vmatmul.mubr.msk.f32.vlgmr.msra.gmra.mrb[34].mxu0 %vm369_vm2, %v2398_v23 }
 0x80a   :  { %v2775_v40 = vpop.f32.mrb[32].mxu1  ;;  %7196 = vmatpush3.msra.mxu0 %v8354_v18  ;;  %v7184_v41 = vpop.f32.mrb[33].mxu0  ;;  %7197 = vmatprep.mubr.msk.f32.mxu0 %vm369_vm2, %v2471_v15 }
 0x80b   :  { %v7179_v44 = vpop.f32.mrb[33].mxu1  ;;  %7223 = vmatprep.subr.mxu0 %v7773_v48  ;;  %v3502_v46 = vpop.permute.xlu1 %3501 }
 0x80d   :  { %7198 = vmatmul.mubr.msk.f32.vlgmr.msra.gmra.mrb[36].mxu0 %vm369_vm2, %v2547_v13 }
 0x80e   :  { %7200 = vmatprep.mubr.msk.f32.mxu0 %vm369_vm2, %v2623_v31 }
 0x80f   :  { %v3580_v29 = vpop.permute.xlu1 %3579 }
 0x811   :  { %7224 = vmatpush3.xpose.msk.msra.mxu0 %vm369_vm2, %v3268_v36 }
 0x812   :  { %7201 = vmatmul.mubr.msk.f32.gmra.mrb[38].mxu0 %vm369_vm2, %v2699_v34  ;;  %7228 = vmatprep.subr.mxu0 %v7773_v48 }
 0x813   :  { %7203 = vmatprep.mubr.msk.f32.mxu0 %vm369_vm2, %v2775_v40  ;;  %v3658_v56 = vpop.permute.xlu1 %3657 }
 0x816   :  { %7204 = vmatmul.mubr.msk.f32.gmra.mrb[40].mxu0 %vm369_vm2, %v2851_v37 }
 0x817   :  { %7225 = vmatprep.mubr.msk.f32.mxu0 %vm7774_vm1, %v7773_v48  ;;  %v3736_v50 = vpop.permute.xlu1 %3735 }
 0x81a   :  { %7226 = vmatmul.mubr.msk.f32.vlgmr.msra.gmra.mrb[42].mxu0 %vm369_vm2, %v3266_v43 }
 0x81b   :  { %7229 = vmatpush3.xpose.msk.msra.mxu0 %vm369_vm2, %v3346_v45  ;;  %7230 = vmatprep.mubr.msk.f32.mxu0 %vm7774_vm1, %v7773_v48  ;;  %v3814_v58 = vpop.permute.xlu1 %3813 }
 0x81c   :  { %7233 = vmatprep.subr.mxu0 %v7773_v48 }
 0x81e   :  { %7231 = vmatmul.mubr.msk.f32.vlgmr.msra.gmra.mrb[44].mxu0 %vm369_vm2, %v3344_v42 }
 0x81f   :  { %7234 = vmatpush3.xpose.msk.msra.mxu0 %vm369_vm2, %v3424_v28  ;;  %7235 = vmatprep.mubr.msk.f32.mxu0 %vm7774_vm1, %v7773_v48 }
 0x820   :  { %7238 = vmatprep.subr.mxu0 %v7773_v48 }
 0x822   :  { %7236 = vmatmul.mubr.msk.f32.vlgmr.msra.gmra.mrb[46].mxu0 %vm369_vm2, %v3422_v21 }
 0x823   :  { %7239 = vmatpush3.xpose.msk.msra.mxu0 %vm369_vm2, %v3502_v46  ;;  %7240 = vmatprep.mubr.msk.f32.mxu0 %vm7774_vm1, %v7773_v48 }
 0x824   :  { %7243 = vmatprep.subr.mxu0 %v7773_v48 }
 0x826   :  { %7241 = vmatmul.mubr.msk.f32.vlgmr.msra.gmra.mrb[48].mxu0 %vm369_vm2, %v3500_v51 }
 0x827   :  { %7244 = vmatpush3.xpose.msk.msra.mxu0 %vm369_vm2, %v3580_v29  ;;  %7245 = vmatprep.mubr.msk.f32.mxu0 %vm7774_vm1, %v7773_v48 }
 0x828   :  { %7248 = vmatprep.subr.mxu0 %v7773_v48 }
 0x82a   :  { %7246 = vmatmul.mubr.msk.f32.vlgmr.msra.gmra.mrb[50].mxu0 %vm369_vm2, %v3578_v38 }
 0x82b   :  { %7249 = vmatpush3.xpose.msk.msra.mxu0 %vm369_vm2, %v3658_v56  ;;  %7250 = vmatprep.mubr.msk.f32.mxu0 %vm7774_vm1, %v7773_v48 }
 0x82c   :  { %7253 = vmatprep.subr.mxu0 %v7773_v48 }
 0x82e   :  { %7251 = vmatmul.mubr.msk.f32.vlgmr.msra.gmra.mrb[52].mxu0 %vm369_vm2, %v3656_v57 }
 0x82f   :  { %7254 = vmatpush3.xpose.msk.msra.mxu0 %vm369_vm2, %v3736_v50  ;;  %7255 = vmatprep.mubr.msk.f32.mxu0 %vm7774_vm1, %v7773_v48 }
 0x830   :  { %7258 = vmatprep.subr.mxu0 %v7773_v48 }
 0x832   :  { %7256 = vmatmul.mubr.msk.f32.vlgmr.msra.gmra.mrb[54].mxu0 %vm369_vm2, %v3734_v49 }
 0x833   :  { %7259 = vmatpush3.xpose.msk.msra.mxu0 %vm369_vm2, %v3814_v58  ;;  %7260 = vmatprep.mubr.msk.f32.mxu0 %vm7774_vm1, %v7773_v48 }
 0x834   :  { %7268 = vmatprep.subr.mxu0 %v7773_v48 }
 0x836   :  { %7261 = vmatmul.mubr.msk.f32.vlgmr.msra.gmra.mrb[56].mxu0 %vm369_vm2, %v3812_v60 }
 0x837   :  { %7270 = vmatprep.mubr.msk.f32.mxu0 %vm7774_vm1, %v7773_v48 }
 0x84c   :  { %v2331_v63 = vpop.xlane.xlu1 %2330 }
 0x84d   :  { %v2341_v1 = vsub.f32 %v8345_v5, %v2331_v63 }
 0x84f   :  { %v2355_v11 = vmul.f32 1.442695, %v2341_v1 }
 0x851   :  { %7641 = vpow2.f32 %v2355_v11  ;;  %v52_v11 = vld [vmem:[%s8974_s5] sm:$0xff] }
 0x85b   :  { %v7642_v10 = vpop.eup %7641 }
 0x85c   :  { %v2377_v2 = vsel %vm369_vm2, %v7642_v10, 0.0 }
 0x85d   :  { %2378 = vadd.xlane.f32.xlu0 %v2377_v2 }
 0x873   :  { %2855 = vrot.lane.b32.xlu0 %v7991_v8, %s7779_s21 }
 0x8dc   :  { %v8419_v62 = vpop.f32.mrb[34].mxu0 }
 0x8dd   :  { %v7194_v13 = vpop.f32.mrb[35].mxu0 }
 0x8e0   :  { %v8421_v17 = vpop.f32.mrb[36].mxu0 }
 0x8e1   :  { %v8423_v24 = vpop.f32.mrb[37].mxu0 }
 0x8e5   :  { %v8425_v15 = vpop.f32.mrb[38].mxu0 }
 0x8e6   :  { %v8427_v27 = vpop.f32.mrb[39].mxu0 }
 0x8e9   :  { %v8429_v5 = vpop.f32.mrb[40].mxu0 }
 0x8ea   :  { %v8431_v31 = vpop.f32.mrb[41].mxu0  ;;  %v2379_v32 = vpop.xlane.xlu0 %2378 }
 0x8eb   :  { %7643 = vrcp.f32 %v2379_v32 }
 0x8ed   :  { %v3339_v34 = vpop.f32.mrb[42].mxu0 }
 0x8ee   :  { %v7227_v35 = vpop.f32.mrb[43].mxu0  ;;  %v2856_v20 = vpop.permute.xlu0 %2855  ;;  %v3889_v23 = vsel %vm369_vm2, %v3339_v34, -inf }
 0x8ef   :  { %3890 = vmax.xlane.f32.xlu1 %v3889_v23  ;;  %7186 = vmatpush3.msra.mxu1 %v2856_v20 }
 0x8f0   :  { %7523 = vmatprep.subr.mxu1 %v8354_v18 }
 0x8f1   :  { %v3417_v36 = vpop.f32.mrb[44].mxu0 }
 0x8f2   :  { %v7232_v37 = vpop.f32.mrb[45].mxu0  ;;  %v3892_v40 = vsel %vm369_vm2, %v3417_v36, -inf }
 0x8f3   :  { %3893 = vmax.xlane.f32.xlu1 %v3892_v40 }
 0x8f5   :  { %v7644_v41 = vpop.eup %7643  ;;  %v3495_v43 = vpop.f32.mrb[46].mxu0 }
 0x8f6   :  { %v2397_v44 = vmul.f32 %v7644_v41, %v7642_v10  ;;  %v7237_v45 = vpop.f32.mrb[47].mxu0  ;;  %v3895_v42 = vsel %vm369_vm2, %v3495_v43, -inf }
 0x8f7   :  { %3896 = vmax.xlane.f32.xlu1 %v3895_v42 }
 0x8f8   :  { %7188 = vmatmul.mubr.msk.f32.vlgmr.msra.gmra.mrb[34].mxu1 %vm369_vm2, %v2397_v44 }
 0x8f9   :  { %v3573_v28 = vpop.f32.mrb[48].mxu0  ;;  %7524 = vmatpush3.msra.mxu1 %v8354_v18 }
 0x8fa   :  { %v7242_v21 = vpop.f32.mrb[49].mxu0  ;;  %v3898_v46 = vsel %vm369_vm2, %v3573_v28, -inf  ;;  %7209 = vmatprep.subr.mxu1 %v52_v11 }
 0x8fb   :  { %3899 = vmax.xlane.f32.xlu1 %v3898_v46 }
 0x8fd   :  { %v3651_v51 = vpop.f32.mrb[50].mxu0 }
 0x8fe   :  { %v7247_v29 = vpop.f32.mrb[51].mxu0  ;;  %v3901_v38 = vsel %vm369_vm2, %v3651_v51, -inf }
 0x8ff   :  { %3902 = vmax.xlane.f32.xlu1 %v3901_v38 }
 0x901   :  { %v3729_v56 = vpop.f32.mrb[52].mxu0 }
 0x902   :  { %v7252_v57 = vpop.f32.mrb[53].mxu0  ;;  %v3904_v50 = vsel %vm369_vm2, %v3729_v56, -inf }
 0x903   :  { %3905 = vmax.xlane.f32.xlu0 %v3904_v50 }
 0x905   :  { %v8442_v49 = vpop.f32.mrb[54].mxu0 }
 0x906   :  { %v7257_v58 = vpop.f32.mrb[55].mxu0  ;;  %v3907_v63 = vsel %vm369_vm2, %v8442_v49, -inf }
 0x909   :  { %v8444_v60 = vpop.f32.mrb[56].mxu0 }
 0x90a   :  { %v7262_v18 = vpop.f32.mrb[57].mxu0  ;;  %v3910_v1 = vsel %vm369_vm2, %v8444_v60, -inf }
 0x910   :  { %4053 = vrot.lane.b32.xlu1 %v7974_v59, %s7782_s26 }
 0x914   :  { %4129 = vrot.lane.b32.xlu1 %v7980_v0, %s7782_s26 }
 0x919   :  { %3977 = vrot.lane.b32.xlu0 %v7976_v61, %s7782_s26 }
 0x91d   :  { %4205 = vrot.lane.b32.xlu0 %v7983_v3, %s7782_s26 }
 0x921   :  { %4357 = vrot.lane.b32.xlu0 %v7989_v7, %s7782_s26 }
 0x938   :  { %3908 = vmax.xlane.f32.xlu1 %v3907_v63 }
 0x93c   :  { %3911 = vmax.xlane.f32.xlu1 %v3910_v1 }
 0x94d   :  { %4281 = vrot.lane.b32.xlu1 %v7985_v4, %s7782_s26 }
 0x97c   :  { %v3891_v10 = vpop.xlane.xlu1 %3890 }
 0x97d   :  { %v3913_v2 = vsub.f32 %v3339_v34, %v3891_v10 }
 0x97f   :  { %v3921_v13 = vmul.f32 1.442695, %v3913_v2 }
 0x980   :  { %v3894_v32 = vpop.xlane.xlu1 %3893 }
 0x981   :  { %7645 = vpow2.f32 %v3921_v13  ;;  %v3914_v35 = vsub.f32 %v3417_v36, %v3894_v32 }
 0x983   :  { %v3923_v20 = vmul.f32 1.442695, %v3914_v35 }
 0x984   :  { %v3897_v23 = vpop.xlane.xlu1 %3896 }
 0x985   :  { %7647 = vpow2.f32 %v3923_v20  ;;  %v3915_v37 = vsub.f32 %v3495_v43, %v3897_v23 }
 0x987   :  { %v3925_v40 = vmul.f32 1.442695, %v3915_v37 }
 0x988   :  { %v3900_v41 = vpop.xlane.xlu1 %3899 }
 0x989   :  { %7649 = vpow2.f32 %v3925_v40  ;;  %v3916_v44 = vsub.f32 %v3573_v28, %v3900_v41 }
 0x98b   :  { %v8465_v45 = vpop.eup %7645  ;;  %v3927_v42 = vmul.f32 1.442695, %v3916_v44 }
 0x98c   :  { %v3903_v21 = vpop.xlane.xlu1 %3902  ;;  %v3937_v46 = vsel %vm369_vm2, %v8465_v45, 0.0 }
 0x98d   :  { %7651 = vpow2.f32 %v3927_v42  ;;  %v3917_v34 = vsub.f32 %v3651_v51, %v3903_v21  ;;  %3938 = vadd.xlane.f32.xlu1 %v3937_v46 }
 0x98f   :  { %v8469_v29 = vpop.eup %7647  ;;  %v3929_v36 = vmul.f32 1.442695, %v3917_v34 }
 0x990   :  { %v4054_v38 = vpop.permute.xlu1 %4053  ;;  %v3906_v57 = vpop.xlane.xlu0 %3905  ;;  %v3940_v43 = vsel %vm369_vm2, %v8469_v29, 0.0 }
 0x991   :  { %7653 = vpow2.f32 %v3929_v36  ;;  %v3918_v28 = vsub.f32 %v3729_v56, %v3906_v57  ;;  %7269 = vmatpush3.msra.mxu0 %v4054_v38  ;;  %3941 = vadd.xlane.f32.xlu1 %v3940_v43  ;;  %v54_v43 = vld [vmem:[%s8974_s5 + $0x10] sm:$0xff] }
 0x992   :  { %7278 = vmatprep.subr.mxu0 %v7773_v48 }
 0x993   :  { %v8474_v50 = vpop.eup %7649  ;;  %v3931_v58 = vmul.f32 1.442695, %v3918_v28 }
 0x994   :  { %v3943_v51 = vsel %vm369_vm2, %v8474_v50, 0.0  ;;  %v8490_v13 = vpop.permute.xlu1 %4129 }
 0x995   :  { %7655 = vpow2.f32 %v3931_v58  ;;  %3944 = vadd.xlane.f32.xlu1 %v3943_v51 }
 0x997   :  { %v8478_v18 = vpop.eup %7651 }
 0x998   :  { %v3946_v63 = vsel %vm369_vm2, %v8478_v18, 0.0 }
 0x999   :  { %3947 = vadd.xlane.f32.xlu1 %v3946_v63 }
 0x99b   :  { %v8482_v1 = vpop.eup %7653 }
 0x99c   :  { %v3949_v56 = vsel %vm369_vm2, %v8482_v1, 0.0 }
 0x99d   :  { %3950 = vadd.xlane.f32.xlu1 %v3949_v56 }
 0x99f   :  { %v8486_v10 = vpop.eup %7655 }
 0x9a0   :  { %v3952_v2 = vsel %vm369_vm2, %v8486_v10, 0.0 }
 0x9a1   :  { %3953 = vadd.xlane.f32.xlu1 %v3952_v2 }
 0x9c5   :  { %v3909_v32 = vpop.xlane.xlu1 %3908 }
 0x9c6   :  { %v3919_v35 = vsub.f32 %v8442_v49, %v3909_v32  ;;  %v3978_v49 = vpop.permute.xlu0 %3977 }
 0x9c8   :  { %v3933_v20 = vmul.f32 1.442695, %v3919_v35 }
 0x9c9   :  { %v3912_v23 = vpop.xlane.xlu1 %3911 }
 0x9ca   :  { %7657 = vpow2.f32 %v3933_v20  ;;  %v3920_v37 = vsub.f32 %v8444_v60, %v3912_v23 }
 0x9cb   :  { %v2927_v40 = vpop.f32.mrb[34].mxu1 }
 0x9cc   :  { %v3935_v41 = vmul.f32 1.442695, %v3920_v37  ;;  %v7189_v44 = vpop.f32.mrb[35].mxu1  ;;  %7206 = vmatprep.mubr.msk.f32.mxu1 %vm369_vm2, %v2927_v40 }
 0x9cd   :  { %7207 = vmatmul.mubr.msk.f32.vlgmr.msra.gmra.mrb[36].mxu1 %vm369_vm2, %v8419_v62 }
 0x9ce   :  { %7659 = vpow2.f32 %v3935_v41  ;;  %7211 = vmatprep.mubr.msk.f32.mxu1 %vm369_vm2, %v8253_v33  ;;  %7210 = vmatpush3.msra.mxu1 %v52_v11 }
 0x9cf   :  { %7263 = vmatprep.subr.mxu1 %v7773_v48 }
 0x9d1   :  { %7212 = vmatmul.mubr.msk.f32.vlgmr.msra.gmra.mrb[38].mxu1 %vm369_vm2, %v8255_v47 }
 0x9d2   :  { %7264 = vmatpush3.msra.mxu1 %v3978_v49  ;;  %7214 = vmatprep.mubr.msk.f32.mxu1 %vm369_vm2, %v8257_v52 }
 0x9d3   :  { %7273 = vmatprep.subr.mxu1 %v7773_v48 }
 0x9d4   :  { %v8505_v60 = vpop.eup %7657 }
 0x9d5   :  { %v3955_v62 = vsel %vm369_vm2, %v8505_v60, 0.0  ;;  %7215 = vmatmul.mubr.msk.f32.gmra.mrb[40].mxu1 %vm369_vm2, %v8259_v53 }
 0x9d6   :  { %3956 = vadd.xlane.f32.xlu0 %v3955_v62  ;;  %7217 = vmatprep.mubr.msk.f32.mxu1 %vm369_vm2, %v8261_v54  ;;  %v4206_v54 = vpop.permute.xlu0 %4205 }
 0x9d8   :  { %v8513_v33 = vpop.eup %7659 }
 0x9d9   :  { %v3958_v47 = vsel %vm369_vm2, %v8513_v33, 0.0  ;;  %7218 = vmatmul.mubr.msk.f32.gmra.mrb[42].mxu1 %vm369_vm2, %v8263_v55 }
 0x9da   :  { %3959 = vadd.xlane.f32.xlu1 %v3958_v47  ;;  %7220 = vmatprep.mubr.msk.f32.mxu1 %vm369_vm2, %v8277_v6  ;;  %v4358_v42 = vpop.permute.xlu0 %4357 }
 0x9dd   :  { %7221 = vmatmul.mubr.msk.f32.gmra.mrb[36].mxu1 %vm369_vm2, %v8265_v39 }
 0x9de   :  { %7265 = vmatprep.mubr.msk.f32.mxu1 %vm7774_vm1, %v7773_v48 }
 0x9eb   :  { %4433 = vrot.lane.b32.xlu1 %v7991_v8, %s7782_s26 }
 0x9ec   :  { %4509 = vrot.lane.b32.xlu0 %v7995_v9, %s7782_s26 }
 0x9ef   :  { %4724 = vrot.lane.b32.xlu1 %v7976_v61, %s7783_s29 }
 0x9f0   :  { %4722 = vrot.lane.b32.xlu0 %v8004_v12, %s7784_s30  ;;  %v4282_v12 = vpop.permute.xlu1 %4281 }
 0x9f3   :  { %4802 = vrot.lane.b32.xlu1 %v7974_v59, %s7783_s29 }
 0x9f4   :  { %4800 = vrot.lane.b32.xlu0 %v8013_v14, %s7784_s30 }
 0x9f7   :  { %4880 = vrot.lane.b32.xlu1 %v7980_v0, %s7783_s29 }
 0x9f8   :  { %4878 = vrot.lane.b32.xlu0 %v8022_v16, %s7784_s30 }
 0x9fb   :  { %4958 = vrot.lane.b32.xlu1 %v7983_v3, %s7783_s29 }
 0x9fc   :  { %4956 = vrot.lane.b32.xlu0 %v8036_v22, %s7784_s30 }
 0x9ff   :  { %5036 = vrot.lane.b32.xlu1 %v7985_v4, %s7783_s29 }
 0xa00   :  { %5114 = vrot.lane.b32.xlu0 %v7989_v7, %s7783_s29 }
 0xa03   :  { %5034 = vrot.lane.b32.xlu1 %v8053_v26, %s7784_s30 }
 0xa04   :  { %5112 = vrot.lane.b32.xlu0 %v8032_v19, %s7784_s30 }
 0xa07   :  { %5192 = vrot.lane.b32.xlu1 %v7991_v8, %s7783_s29 }
 0xa08   :  { %5270 = vrot.lane.b32.xlu0 %v7995_v9, %s7783_s29 }
 0xa0b   :  { %5190 = vrot.lane.b32.xlu1 %v8065_v30, %s7784_s30 }
 0xa0c   :  { %5268 = vrot.lane.b32.xlu0 %v8050_v25, %s7784_s30 }
 0xa1a   :  { %v3939_v14 = vpop.xlane.xlu1 %3938 }
 0xa1b   :  { %7661 = vrcp.f32 %v3939_v14 }
 0xa1e   :  { %v3942_v16 = vpop.xlane.xlu1 %3941 }
 0xa1f   :  { %7663 = vrcp.f32 %v3942_v16 }
 0xa22   :  { %v3945_v22 = vpop.xlane.xlu1 %3944 }
 0xa23   :  { %7665 = vrcp.f32 %v3945_v22 }
 0xa25   :  { %v7662_v52 = vpop.eup %7661 }
 0xa26   :  { %v3969_v26 = vmul.f32 %v7662_v52, %v8465_v45  ;;  %v3948_v53 = vpop.xlane.xlu1 %3947 }
 0xa27   :  { %7667 = vrcp.f32 %v3948_v53 }
 0xa28   :  { %7266 = vmatmul.mubr.msk.f32.vlgmr.msra.gmra.mrb[44].mxu1 %vm369_vm2, %v3969_v26 }
 0xa29   :  { %v7664_v19 = vpop.eup %7663  ;;  %7274 = vmatpush3.msra.mxu1 %v8490_v13  ;;  %7275 = vmatprep.mubr.msk.f32.mxu1 %vm7774_vm1, %v7773_v48 }
 0xa2a   :  { %v3970_v25 = vmul.f32 %v7664_v19, %v8469_v29  ;;  %v3951_v30 = vpop.xlane.xlu1 %3950  ;;  %7283 = vmatprep.subr.mxu1 %v7773_v48 }
 0xa2b   :  { %7669 = vrcp.f32 %v3951_v30 }
 0xa2c   :  { %7271 = vmatmul.mubr.msk.f32.vlgmr.msra.gmra.mrb[58].mxu0 %vm369_vm2, %v3970_v25 }
 0xa2d   :  { %v7666_v55 = vpop.eup %7665  ;;  %7279 = vmatpush3.msra.mxu0 %v4206_v54  ;;  %7280 = vmatprep.mubr.msk.f32.mxu0 %vm7774_vm1, %v7773_v48 }
 0xa2e   :  { %v3971_v39 = vmul.f32 %v7666_v55, %v8474_v50  ;;  %v3954_v6 = vpop.xlane.xlu1 %3953  ;;  %7288 = vmatprep.subr.mxu0 %v7773_v48 }
 0xa2f   :  { %7671 = vrcp.f32 %v3954_v6 }
 0xa30   :  { %7276 = vmatmul.mubr.msk.f32.vlgmr.msra.gmra.mrb[46].mxu1 %vm369_vm2, %v3971_v39 }
 0xa31   :  { %v7668_v11 = vpop.eup %7667  ;;  %7284 = vmatpush3.msra.mxu1 %v4282_v12  ;;  %7285 = vmatprep.mubr.msk.f32.mxu1 %vm7774_vm1, %v7773_v48 }
 0xa32   :  { %v3972_v45 = vmul.f32 %v7668_v11, %v8478_v18  ;;  %7293 = vmatprep.subr.mxu1 %v7773_v48 }
 0xa34   :  { %7281 = vmatmul.mubr.msk.f32.vlgmr.msra.gmra.mrb[60].mxu0 %vm369_vm2, %v3972_v45 }
 0xa35   :  { %v7670_v21 = vpop.eup %7669  ;;  %7289 = vmatpush3.msra.mxu0 %v4358_v42  ;;  %7290 = vmatprep.mubr.msk.f32.mxu0 %vm7774_vm1, %v7773_v48 }
 0xa36   :  { %v3973_v46 = vmul.f32 %v7670_v21, %v8482_v1  ;;  %7298 = vmatprep.subr.mxu0 %v7773_v48 }
 0xa38   :  { %7286 = vmatmul.mubr.msk.f32.vlgmr.msra.gmra.mrb[48].mxu1 %vm369_vm2, %v3973_v46 }
 0xa39   :  { %v7672_v34 = vpop.eup %7671  ;;  %7295 = vmatprep.mubr.msk.f32.mxu1 %vm7774_vm1, %v7773_v48 }
 0xa3a   :  { %v3974_v29 = vmul.f32 %v7672_v34, %v8486_v10 }
 0xa3c   :  { %7291 = vmatmul.mubr.msk.f32.vlgmr.msra.gmra.mrb[62].mxu0 %vm369_vm2, %v3974_v29 }
 0xa3d   :  { %7300 = vmatprep.mubr.msk.f32.mxu0 %vm7774_vm1, %v7773_v48 }
 0xa63   :  { %v3957_v36 = vpop.xlane.xlu0 %3956 }
 0xa64   :  { %7673 = vrcp.f32 %v3957_v36 }
 0xa67   :  { %v4510_v38 = vpop.permute.xlu0 %4509  ;;  %v3960_v57 = vpop.xlane.xlu1 %3959 }
 0xa68   :  { %7675 = vrcp.f32 %v3960_v57  ;;  %7299 = vmatpush3.msra.mxu0 %v4510_v38 }
 0xa69   :  { %7317 = vmatprep.subr.mxu0 %v7773_v48 }
 0xa6b   :  { %v4723_v28 = vpop.permute.xlu0 %4722  ;;  %v4434_v50 = vpop.permute.xlu1 %4433 }
 0xa6c   :  { %7294 = vmatpush3.msra.mxu1 %v4434_v50 }
 0xa6d   :  { %7303 = vmatprep.subr.mxu1 %v54_v43 }
 0xa6e   :  { %v7674_v58 = vpop.eup %7673 }
 0xa6f   :  { %v3975_v51 = vmul.f32 %v7674_v58, %v8505_v60  ;;  %v4801_v18 = vpop.permute.xlu0 %4800  ;;  %v4725_v63 = vpop.permute.xlu1 %4724 }
 0xa71   :  { %7296 = vmatmul.mubr.msk.f32.vlgmr.msra.gmra.mrb[50].mxu1 %vm369_vm2, %v3975_v51 }
 0xa72   :  { %v7676_v1 = vpop.eup %7675  ;;  %7304 = vmatpush3.msra.mxu1 %v54_v43 }
 0xa73   :  { %v3976_v56 = vmul.f32 %v7676_v1, %v8513_v33  ;;  %v4879_v10 = vpop.permute.xlu0 %4878  ;;  %7337 = vmatprep.subr.mxu1 %v7773_v48  ;;  %v4803_v2 = vpop.permute.xlu1 %4802 }
 0xa75   :  { %7301 = vmatmul.mubr.msk.f32.vlgmr.msra.gmra.mrb[64].mxu0 %vm369_vm2, %v3976_v56 }
 0xa76   :  { %7318 = vmatpush3.xpose.msk.msra.mxu0 %vm369_vm2, %v4725_v63  ;;  %7319 = vmatprep.mubr.msk.f32.mxu0 %vm7774_vm1, %v7773_v48 }
 0xa77   :  { %v4957_v13 = vpop.permute.xlu0 %4956  ;;  %7322 = vmatprep.subr.mxu0 %v7773_v48  ;;  %v4881_v32 = vpop.permute.xlu1 %4880 }
 0xa79   :  { %7320 = vmatmul.mubr.msk.f32.vlgmr.msra.gmra.mrb[66].mxu0 %vm369_vm2, %v4723_v28 }
 0xa7a   :  { %7323 = vmatpush3.xpose.msk.msra.mxu0 %vm369_vm2, %v4803_v2  ;;  %7324 = vmatprep.mubr.msk.f32.mxu0 %vm7774_vm1, %v7773_v48 }
 0xa7b   :  { %v5115_v35 = vpop.permute.xlu0 %5114  ;;  %7327 = vmatprep.subr.mxu0 %v7773_v48  ;;  %v4959_v23 = vpop.permute.xlu1 %4958 }
 0xa7d   :  { %7325 = vmatmul.mubr.msk.f32.vlgmr.msra.gmra.mrb[68].mxu0 %vm369_vm2, %v4801_v18 }
 0xa7e   :  { %7328 = vmatpush3.xpose.msk.msra.mxu0 %vm369_vm2, %v4881_v32  ;;  %7329 = vmatprep.mubr.msk.f32.mxu0 %vm7774_vm1, %v7773_v48 }
 0xa7f   :  { %7332 = vmatprep.subr.mxu0 %v7773_v48  ;;  %v5113_v20 = vpop.permute.xlu0 %5112  ;;  %v5037_v60 = vpop.permute.xlu1 %5036 }
 0xa81   :  { %7330 = vmatmul.mubr.msk.f32.vlgmr.msra.gmra.mrb[70].mxu0 %vm369_vm2, %v4879_v10 }
 0xa82   :  { %7333 = vmatpush3.xpose.msk.msra.mxu0 %vm369_vm2, %v4959_v23  ;;  %7334 = vmatprep.mubr.msk.f32.mxu0 %vm7774_vm1, %v7773_v48 }
 0xa83   :  { %7342 = vmatprep.subr.mxu0 %v7773_v48  ;;  %v5271_v37 = vpop.permute.xlu0 %5270  ;;  %v5035_v53 = vpop.permute.xlu1 %5034 }
 0xa85   :  { %7335 = vmatmul.mubr.msk.f32.vlgmr.msra.gmra.mrb[72].mxu0 %vm369_vm2, %v4957_v13 }
 0xa86   :  { %7343 = vmatpush3.xpose.msk.msra.mxu0 %vm369_vm2, %v5115_v35  ;;  %7344 = vmatprep.mubr.msk.f32.mxu0 %vm7774_vm1, %v7773_v48 }
 0xa87   :  { %7352 = vmatprep.subr.mxu0 %v7773_v48  ;;  %v5269_v40 = vpop.permute.xlu0 %5268  ;;  %v5193_v55 = vpop.permute.xlu1 %5192 }
 0xa89   :  { %7345 = vmatmul.mubr.msk.f32.vlgmr.msra.gmra.mrb[74].mxu0 %vm369_vm2, %v5113_v20 }
 0xa8a   :  { %7353 = vmatpush3.xpose.msk.msra.mxu0 %vm369_vm2, %v5271_v37  ;;  %7354 = vmatprep.mubr.msk.f32.mxu0 %vm7774_vm1, %v7773_v48 }
 0xa8b   :  { %7362 = vmatprep.subr.mxu0 %v7773_v48  ;;  %v5191_v45 = vpop.permute.xlu1 %5190 }
 0xa8d   :  { %7355 = vmatmul.mubr.msk.f32.vlgmr.msra.gmra.mrb[76].mxu0 %vm369_vm2, %v5269_v40 }
 0xa8e   :  { %7364 = vmatprep.mubr.msk.f32.mxu0 %vm7774_vm1, %v7773_v48 }
 0xafb   :  { %v4049_v41 = vpop.f32.mrb[44].mxu1 }
 0xafc   :  { %v7267_v44 = vpop.f32.mrb[45].mxu1  ;;  %7305 = vmatprep.mubr.msk.f32.mxu1 %vm369_vm2, %v4049_v41 }
 0xaff   :  { %v4125_v49 = vpop.f32.mrb[58].mxu0 }
 0xb00   :  { %v7272_v62 = vpop.f32.mrb[59].mxu0  ;;  %7306 = vmatmul.mubr.msk.f32.vlgmr.msra.gmra.mrb[38].mxu1 %vm369_vm2, %v4125_v49 }
 0xb01   :  { %7338 = vmatpush3.xpose.msk.msra.mxu1 %vm369_vm2, %v5037_v60 }
 0xb02   :  { %7347 = vmatprep.subr.mxu1 %v7773_v48 }
 0xb03   :  { %v4201_v33 = vpop.f32.mrb[46].mxu1 }
 0xb04   :  { %v7277_v47 = vpop.f32.mrb[47].mxu1  ;;  %7308 = vmatprep.mubr.msk.f32.mxu1 %vm369_vm2, %v4201_v33 }
 0xb07   :  { %v4277_v12 = vpop.f32.mrb[60].mxu0 }
 0xb08   :  { %v7282_v14 = vpop.f32.mrb[61].mxu0  ;;  %7309 = vmatmul.mubr.msk.f32.gmra.mrb[40].mxu1 %vm369_vm2, %v4277_v12 }
 0xb0b   :  { %v4353_v16 = vpop.f32.mrb[48].mxu1 }
 0xb0c   :  { %v7287_v22 = vpop.f32.mrb[49].mxu1  ;;  %7311 = vmatprep.mubr.msk.f32.mxu1 %vm369_vm2, %v4353_v16 }
 0xb0f   :  { %v4429_v52 = vpop.f32.mrb[62].mxu0 }
 0xb10   :  { %v7292_v26 = vpop.f32.mrb[63].mxu0  ;;  %7312 = vmatmul.mubr.msk.f32.gmra.mrb[42].mxu1 %vm369_vm2, %v4429_v52 }
 0xb44   :  { %v4505_v19 = vpop.f32.mrb[50].mxu1 }
 0xb45   :  { %v7297_v25 = vpop.f32.mrb[51].mxu1  ;;  %7314 = vmatprep.mubr.msk.f32.mxu1 %vm369_vm2, %v4505_v19 }
 0xb48   :  { %v4581_v30 = vpop.f32.mrb[64].mxu0 }
 0xb49   :  { %v7302_v54 = vpop.f32.mrb[65].mxu0  ;;  %7315 = vmatmul.mubr.msk.f32.gmra.mrb[36].mxu1 %vm369_vm2, %v4581_v30 }
 0xb4a   :  { %7339 = vmatprep.mubr.msk.f32.mxu1 %vm7774_vm1, %v7773_v48 }
 0xb4c   :  { %v8627_v39 = vpop.f32.mrb[66].mxu0 }
 0xb4d   :  { %v7321_v6 = vpop.f32.mrb[67].mxu0  ;;  %7340 = vmatmul.mubr.msk.f32.vlgmr.msra.gmra.mrb[52].mxu1 %vm369_vm2, %v5035_v53  ;;  %v5346_v11 = vsel %vm369_vm2, %v8627_v39, -inf }
 0xb4e   :  { %7348 = vmatpush3.xpose.msk.msra.mxu1 %vm369_vm2, %v5193_v55  ;;  %5347 = vmax.xlane.f32.xlu1 %v5346_v11 }
 0xb4f   :  { %7349 = vmatprep.mubr.msk.f32.mxu1 %vm7774_vm1, %v7773_v48  ;;  %7357 = vmatprep.subr.mxu1 %v7773_v48 }
 0xb50   :  { %v4874_v42 = vpop.f32.mrb[68].mxu0 }
 0xb51   :  { %v7326_v21 = vpop.f32.mrb[69].mxu0  ;;  %7350 = vmatmul.mubr.msk.f32.vlgmr.msra.gmra.mrb[54].mxu1 %vm369_vm2, %v5191_v45  ;;  %v5349_v46 = vsel %vm369_vm2, %v4874_v42, -inf }
 0xb52   :  { %5350 = vmax.xlane.f32.xlu0 %v5349_v46  ;;  %7359 = vmatprep.mubr.msk.f32.mxu1 %vm7774_vm1, %v7773_v48 }
 0xb54   :  { %v4952_v34 = vpop.f32.mrb[70].mxu0 }
 0xb55   :  { %v7331_v29 = vpop.f32.mrb[71].mxu0  ;;  %v5352_v36 = vsel %vm369_vm2, %v4952_v34, -inf }
 0xb56   :  { %5353 = vmax.xlane.f32.xlu0 %v5352_v36 }
 0xb58   :  { %v5030_v38 = vpop.f32.mrb[72].mxu0 }
 0xb59   :  { %v7336_v57 = vpop.f32.mrb[73].mxu0  ;;  %v5355_v43 = vsel %vm369_vm2, %v5030_v38, -inf }
 0xb5a   :  { %5356 = vmax.xlane.f32.xlu1 %v5355_v43 }
 0xb5c   :  { %v5186_v28 = vpop.f32.mrb[74].mxu0 }
 0xb5d   :  { %v7346_v50 = vpop.f32.mrb[75].mxu0  ;;  %v5361_v58 = vsel %vm369_vm2, %v5186_v28, -inf }
 0xb5e   :  { %5362 = vmax.xlane.f32.xlu1 %v5361_v58 }
 0xb60   :  { %v5342_v51 = vpop.f32.mrb[76].mxu0 }
 0xb61   :  { %v7356_v18 = vpop.f32.mrb[77].mxu0  ;;  %v5367_v63 = vsel %vm369_vm2, %v5342_v51, -inf }
 0xb62   :  { %5368 = vmax.xlane.f32.xlu1 %v5367_v63 }
 0xbdb   :  { %v5348_v2 = vpop.xlane.xlu1 %5347 }
 0xbdc   :  { %v5370_v22 = vsub.f32 %v8627_v39, %v5348_v2 }
 0xbde   :  { %v5378_v26 = vmul.f32 1.442695, %v5370_v22 }
 0xbdf   :  { %v5351_v1 = vpop.xlane.xlu0 %5350 }
 0xbe0   :  { %v5371_v56 = vsub.f32 %v4874_v42, %v5351_v1 }
 0xbe2   :  { %v5380_v10 = vmul.f32 1.442695, %v5371_v56 }
 0xbe3   :  { %v5354_v52 = vpop.xlane.xlu0 %5353 }
 0xbe4   :  { %7677 = vpow2.f32 %v5380_v10  ;;  %v5372_v53 = vsub.f32 %v4952_v34, %v5354_v52 }
 0xbe6   :  { %v5382_v19 = vmul.f32 1.442695, %v5372_v53 }
 0xbe7   :  { %v5357_v13 = vpop.xlane.xlu1 %5356 }
 0xbe8   :  { %v5373_v32 = vsub.f32 %v5030_v38, %v5357_v13 }
 0xbea   :  { %v5384_v35 = vmul.f32 1.442695, %v5373_v32 }
 0xbeb   :  { %v5363_v20 = vpop.xlane.xlu1 %5362 }
 0xbec   :  { %7679 = vpow2.f32 %v5384_v35  ;;  %v5375_v23 = vsub.f32 %v5186_v28, %v5363_v20 }
 0xbee   :  { %v7678_v37 = vpop.eup %7677  ;;  %v5388_v40 = vmul.f32 1.442695, %v5375_v23 }
 0xbef   :  { %v5369_v41 = vpop.xlane.xlu1 %5368  ;;  %v5397_v44 = vsel %vm369_vm2, %v7678_v37, 0.0 }
 0xbf0   :  { %7681 = vpow2.f32 %v5388_v40  ;;  %v5377_v49 = vsub.f32 %v5342_v51, %v5369_v41  ;;  %5398 = vadd.xlane.f32.xlu1 %v5397_v44 }
 0xbf2   :  { %v5392_v60 = vmul.f32 1.442695, %v5377_v49 }
 0xbf4   :  { %7683 = vpow2.f32 %v5392_v60 }
 0xbf5   :  { %7685 = vpow2.f32 %v5378_v26 }
 0xbf6   :  { %v8645_v62 = vpop.eup %7679  ;;  %7687 = vpow2.f32 %v5382_v19 }
 0xbf7   :  { %v5403_v33 = vsel %vm369_vm2, %v8645_v62, 0.0 }
 0xbf8   :  { %5404 = vadd.xlane.f32.xlu1 %v5403_v33 }
 0xbfa   :  { %v8649_v47 = vpop.eup %7681 }
 0xbfb   :  { %v5409_v12 = vsel %vm369_vm2, %v8649_v47, 0.0 }
 0xbfc   :  { %5410 = vadd.xlane.f32.xlu1 %v5409_v12 }
 0xbfe   :  { %v8653_v14 = vpop.eup %7683 }
 0xbff   :  { %v5415_v16 = vsel %vm369_vm2, %v8653_v14, 0.0  ;;  %v7686_v39 = vpop.eup %7685 }
 0xc00   :  { %5416 = vadd.xlane.f32.xlu1 %v5415_v16  ;;  %v5394_v6 = vsel %vm369_vm2, %v7686_v39, 0.0  ;;  %v55_v16 = vld [vmem:[%s8974_s5 + $0x18] sm:$0xff] }
 0xc11   :  { %5510 = vrot.lane.b32.xlu1 %v7974_v59, %s7785_s15 }
 0xc15   :  { %5586 = vrot.lane.b32.xlu1 %v7980_v0, %s7785_s15 }
 0xc19   :  { %5738 = vrot.lane.b32.xlu1 %v7985_v4, %s7785_s15  ;;  %v7688_v4 = vpop.eup %7687 }
 0xc1a   :  { %v5400_v11 = vsel %vm369_vm2, %v7688_v4, 0.0 }
 0xc1d   :  { %5890 = vrot.lane.b32.xlu1 %v7991_v8, %s7785_s15 }
 0xc20   :  { %v5108_v25 = vpop.f32.mrb[52].mxu1 }
 0xc21   :  { %v7341_v30 = vpop.f32.mrb[53].mxu1  ;;  %v5358_v59 = vsel %vm369_vm2, %v5108_v25, -inf }
 0xc22   :  { %5359 = vmax.xlane.f32.xlu0 %v5358_v59 }
 0xc24   :  { %v5264_v54 = vpop.f32.mrb[54].mxu1 }
 0xc25   :  { %v7351_v55 = vpop.f32.mrb[55].mxu1  ;;  %v5364_v0 = vsel %vm369_vm2, %v5264_v54, -inf }
 0xc26   :  { %5365 = vmax.xlane.f32.xlu0 %v5364_v0 }
 0xc2a   :  { %5395 = vadd.xlane.f32.xlu0 %v5394_v6 }
 0xc2e   :  { %5401 = vadd.xlane.f32.xlu0 %v5400_v11 }
 0xc44   :  { %5434 = vrot.lane.b32.xlu0 %v7976_v61, %s7785_s15 }
 0xc48   :  { %5662 = vrot.lane.b32.xlu0 %v7983_v3, %s7785_s15 }
 0xc4c   :  { %5814 = vrot.lane.b32.xlu0 %v7989_v7, %s7785_s15 }
 0xc7d   :  { %v5399_v8 = vpop.xlane.xlu1 %5398 }
 0xc7e   :  { %7689 = vrcp.f32 %v5399_v8 }
 0xc85   :  { %v5405_v45 = vpop.xlane.xlu1 %5404 }
 0xc88   :  { %v7690_v46 = vpop.eup %7689 }
 0xc89   :  { %v5411_v42 = vpop.xlane.xlu1 %5410  ;;  %v5427_v34 = vmul.f32 %v7690_v46, %v7678_v37 }
 0xc8d   :  { %v5417_v21 = vpop.xlane.xlu1 %5416 }
 0xc91   :  { %v5511_v29 = vpop.permute.xlu1 %5510 }
 0xc92   :  { %7363 = vmatpush3.msra.mxu0 %v5511_v29 }
 0xc93   :  { %7365 = vmatmul.mubr.msk.f32.vlgmr.msra.gmra.mrb[78].mxu0 %vm369_vm2, %v5427_v34  ;;  %7372 = vmatprep.subr.mxu0 %v7773_v48 }
 0xc94   :  { %7374 = vmatprep.mubr.msk.f32.mxu0 %vm7774_vm1, %v7773_v48 }
 0xc95   :  { %v5587_v32 = vpop.permute.xlu1 %5586 }
 0xc99   :  { %v5739_v41 = vpop.permute.xlu1 %5738 }
 0xc9d   :  { %v5891_v22 = vpop.permute.xlu1 %5890 }
 0xcaf   :  { %v5360_v61 = vpop.xlane.xlu0 %5359 }
 0xcb0   :  { %v5374_v3 = vsub.f32 %v5108_v25, %v5360_v61 }
 0xcb2   :  { %v5386_v36 = vmul.f32 1.442695, %v5374_v3 }
 0xcb3   :  { %v5366_v7 = vpop.xlane.xlu0 %5365 }
 0xcb4   :  { %7691 = vpow2.f32 %v5386_v36  ;;  %v5376_v38 = vsub.f32 %v5264_v54, %v5366_v7  ;;  %v7741_v36 = vld [vmem:[%s8969_s0 + $0x8] sm:$0xff] }
 0xcb5   :  { %7693 = vrcp.f32 %v5405_v45  ;;  %v6790_v45 = vld [vmem:[%s8975_s6] ss:$0 sm:$0xff] }
 0xcb6   :  { %v5390_v57 = vmul.f32 1.442695, %v5376_v38 }
 0xcb7   :  { %v5396_v43 = vpop.xlane.xlu0 %5395 }
 0xcb8   :  { %7695 = vpow2.f32 %v5390_v57 }
 0xcb9   :  { %7697 = vrcp.f32 %v5396_v43  ;;  %v7742_v43 = vld [vmem:[%s8969_s0] sm:$0xff] }
 0xcba   :  { %7699 = vrcp.f32 %v5411_v42 }
 0xcbb   :  { %v5402_v28 = vpop.xlane.xlu0 %5401 }
 0xcbc   :  { %7701 = vrcp.f32 %v5402_v28 }
 0xcbd   :  { %7703 = vrcp.f32 %v5417_v21 }
 0xcbe   :  { %v7692_v50 = vpop.eup %7691 }
 0xcbf   :  { %v5435_v58 = vpop.permute.xlu0 %5434  ;;  %v5406_v51 = vsel %vm369_vm2, %v7692_v50, 0.0  ;;  %v7694_v18 = vpop.eup %7693 }
 0xcc0   :  { %5407 = vadd.xlane.f32.xlu0 %v5406_v51  ;;  %7358 = vmatpush3.msra.mxu1 %v5435_v58  ;;  %v5429_v56 = vmul.f32 %v7694_v18, %v8645_v62 }
 0xcc1   :  { %7367 = vmatprep.subr.mxu1 %v7773_v48 }
 0xcc2   :  { %v7696_v63 = vpop.eup %7695 }
 0xcc3   :  { %v7698_v1 = vpop.eup %7697  ;;  %v5663_v10 = vpop.permute.xlu0 %5662  ;;  %v5412_v2 = vsel %vm369_vm2, %v7696_v63, 0.0 }
 0xcc4   :  { %v7700_v13 = vpop.eup %7699  ;;  %v5426_v35 = vmul.f32 %v7698_v1, %v7686_v39  ;;  %5413 = vadd.xlane.f32.xlu0 %v5412_v2  ;;  %7373 = vmatpush3.msra.mxu0 %v5663_v10 }
 0xcc5   :  { %7375 = vmatmul.mubr.msk.f32.vlgmr.msra.gmra.mrb[80].mxu0 %vm369_vm2, %v5429_v56  ;;  %7382 = vmatprep.subr.mxu0 %v7773_v48  ;;  %v5431_v23 = vmul.f32 %v7700_v13, %v8649_v47 }
 0xcc6   :  { %v7702_v20 = vpop.eup %7701  ;;  %7360 = vmatmul.mubr.msk.f32.vlgmr.msra.gmra.mrb[56].mxu1 %vm369_vm2, %v5426_v35  ;;  %7384 = vmatprep.mubr.msk.f32.mxu0 %vm7774_vm1, %v7773_v48 }
 0xcc7   :  { %v5428_v37 = vmul.f32 %v7702_v20, %v7688_v4  ;;  %7368 = vmatpush3.msra.mxu1 %v5587_v32  ;;  %v5815_v40 = vpop.permute.xlu0 %5814  ;;  %7369 = vmatprep.mubr.msk.f32.mxu1 %vm7774_vm1, %v7773_v48  ;;  %v7704_v60 = vpop.eup %7703 }
 0xcc8   :  { %7377 = vmatprep.subr.mxu1 %v7773_v48  ;;  %7383 = vmatpush3.msra.mxu0 %v5815_v40  ;;  %v5433_v62 = vmul.f32 %v7704_v60, %v8653_v14 }
 0xcc9   :  { %7385 = vmatmul.mubr.msk.f32.vlgmr.msra.gmra.mrb[82].mxu0 %vm369_vm2, %v5431_v23  ;;  %7392 = vmatprep.subr.mxu0 %v7773_v48 }
 0xcca   :  { %7370 = vmatmul.mubr.msk.f32.vlgmr.msra.gmra.mrb[58].mxu1 %vm369_vm2, %v5428_v37  ;;  %7394 = vmatprep.mubr.msk.f32.mxu0 %vm7774_vm1, %v7773_v48 }
 0xccb   :  { %7378 = vmatpush3.msra.mxu1 %v5739_v41  ;;  %7379 = vmatprep.mubr.msk.f32.mxu1 %vm7774_vm1, %v7773_v48 }
 0xccc   :  { %7387 = vmatprep.subr.mxu1 %v7773_v48 }
 0xcda   :  { %5966 = vrot.lane.b32.xlu0 %v7995_v9, %s7785_s15 }
 0xd4d   :  { %v5408_v44 = vpop.xlane.xlu0 %5407 }
 0xd4e   :  { %7705 = vrcp.f32 %v5408_v44 }
 0xd51   :  { %v5414_v49 = vpop.xlane.xlu0 %5413 }
 0xd52   :  { %7707 = vrcp.f32 %v5414_v49  ;;  %v7745_v49 = vld [vmem:[%s8969_s0 + $0x28] sm:$0xff] }
 0xd55   :  { %v5967_v33 = vpop.permute.xlu0 %5966 }
 0xd56   :  { %7393 = vmatpush3.msra.mxu0 %v5967_v33 }
 0xd57   :  { %7395 = vmatmul.mubr.msk.f32.vlgmr.msra.gmra.mrb[84].mxu0 %vm369_vm2, %v5433_v62 }
 0xd58   :  { %v7706_v47 = vpop.eup %7705 }
 0xd59   :  { %v5430_v12 = vmul.f32 %v7706_v47, %v7692_v50 }
 0xd5b   :  { %7380 = vmatmul.mubr.msk.f32.vlgmr.msra.gmra.mrb[60].mxu1 %vm369_vm2, %v5430_v12 }
 0xd5c   :  { %v7708_v9 = vpop.eup %7707  ;;  %7388 = vmatpush3.msra.mxu1 %v5891_v22  ;;  %7389 = vmatprep.mubr.msk.f32.mxu1 %vm7774_vm1, %v7773_v48 }
 0xd5d   :  { %v5432_v52 = vmul.f32 %v7708_v9, %v7696_v63  ;;  %7397 = vmatprep.subr.mxu1 %v55_v16  ;;  %v7747_v9 = vld [vmem:[%s8969_s0 + $0x38] sm:$0xff] }
 0xd5f   :  { %7390 = vmatmul.mubr.msk.f32.vlgmr.msra.gmra.mrb[62].mxu1 %vm369_vm2, %v5432_v52 }
 0xd60   :  { %7398 = vmatpush3.msra.mxu1 %v55_v16 }
 0xd66   :  { %v5582_v14 = vpop.f32.mrb[78].mxu0 }
 0xd67   :  { %v7366_v26 = vpop.f32.mrb[79].mxu0 }
 0xd98   :  { %v5734_v53 = vpop.f32.mrb[80].mxu0 }
 0xd99   :  { %v5506_v19 = vpop.f32.mrb[56].mxu1  ;;  %v7376_v25 = vpop.f32.mrb[81].mxu0 }
 0xd9a   :  { %v7361_v30 = vpop.f32.mrb[57].mxu1  ;;  %7399 = vmatprep.mubr.msk.f32.mxu1 %vm369_vm2, %v5506_v19 }
 0xd9b   :  { %7400 = vmatmul.mubr.msk.f32.vlgmr.msra.gmra.mrb[38].mxu1 %vm369_vm2, %v5582_v14  ;;  %v7748_v30 = vld [vmem:[%s8969_s0 + $0x30] sm:$0xff] }
 0xd9c   :  { %v5886_v59 = vpop.f32.mrb[82].mxu0 }
 0xd9d   :  { %v5658_v54 = vpop.f32.mrb[58].mxu1  ;;  %v7386_v55 = vpop.f32.mrb[83].mxu0 }
 0xd9e   :  { %v7371_v0 = vpop.f32.mrb[59].mxu1  ;;  %7402 = vmatprep.mubr.msk.f32.mxu1 %vm369_vm2, %v5658_v54 }
 0xd9f   :  { %7403 = vmatmul.mubr.msk.f32.gmra.mrb[40].mxu1 %vm369_vm2, %v5734_v53 }
 0xe2a   :  { %v6038_v48 = vpop.f32.mrb[84].mxu0 }
 0xe2b   :  { %v7396_v39 = vpop.f32.mrb[85].mxu0 }
 0xe2e   :  { %v5810_v6 = vpop.f32.mrb[60].mxu1 }
 0xe2f   :  { %v7381_v4 = vpop.f32.mrb[61].mxu1  ;;  %7405 = vmatprep.mubr.msk.f32.mxu1 %vm369_vm2, %v5810_v6 }
 0xe30   :  { %7406 = vmatmul.mubr.msk.f32.gmra.mrb[42].mxu1 %vm369_vm2, %v5886_v59 }
 0xe32   :  { %v5962_v11 = vpop.f32.mrb[62].mxu1 }
 0xe33   :  { %v7391_v8 = vpop.f32.mrb[63].mxu1  ;;  %7408 = vmatprep.mubr.msk.f32.mxu1 %vm369_vm2, %v5962_v11 }
 0xe34   :  { %7409 = vmatmul.mubr.msk.f32.gmra.mrb[36].mxu1 %vm369_vm2, %v6038_v48 }
 0xe6e   :  { %v7401_v42 = vpop.f32.mrb[38].mxu1 }
 0xe6f   :  { %v7525_v21 = vadd.f32 %v7401_v42, %v8421_v17  ;;  %v6132_v46 = vpop.f32.mrb[39].mxu1 }
 0xe70   :  { %v7526_v34 = vadd.f32 %v6132_v46, %v8423_v24  ;;  %v59_v46 = vld [vmem:[%s8978_s9] sm:$0xff] }
 0xe71   :  { %v6186_v29 = vadd.f32 %v7525_v21, %v6790_v45 }
 0xe72   :  { %v6185_v61 = vadd.f32 %v7526_v34, %v6790_v45  ;;  %v7404_v3 = vpop.f32.mrb[40].mxu1  ;;  %v60_v34 = vld [vmem:[%s8978_s9 + $0x8] sm:$0xff] }
 0xe73   :  { %v8728_v7 = vadd.f32 %v7741_v36, %v6186_v29  ;;  %v7527_v38 = vadd.f32 %v7404_v3, %v8425_v15  ;;  %v6142_v57 = vpop.f32.mrb[41].mxu1  ;;  %v7743_v15 = vld [vmem:[%s8969_s0 + $0x18] sm:$0xff]  ;;  %v7483_v29 = vpack.c.bf16 %v60_v34, %v59_v46 }
 0xe74   :  { %v8734_v17 = vadd.f32 %v7742_v43, %v6185_v61  ;;  %v7528_v24 = vadd.f32 %v6142_v57, %v8427_v27  ;;  %v7744_v27 = vld [vmem:[%s8969_s0 + $0x10] sm:$0xff]  ;;  %v62_v3 = vld [vmem:[%s8978_s9 + $0x18] sm:$0xff] }
 0xe75   :  { %v6188_v28 = vadd.f32 %v7527_v38, %v6790_v45  ;;  %v6204_v50 = vsel %vm89_vm0, %v8728_v7, 0.0  ;;  %v61_v61 = vld [vmem:[%s8978_s9 + $0x10] sm:$0xff]  ;;  %7484 = vmatprep.subr.bf16.mxu0 %v7483_v29 }
 0xe76   :  { %v6187_v58 = vadd.f32 %v7528_v24, %v6790_v45  ;;  %6205 = vadd.xlane.f32.xlu0 %v6204_v50  ;;  %v6201_v51 = vsel %vm89_vm0, %v8734_v17, 0.0  ;;  %v7487_v36 = vpack.c.bf16 %v62_v3, %v61_v61  ;;  %7486 = vmatpush3.bf16.msra.mxu0 %v7483_v29  ;;  %v66_v29 = vld [vmem:[%s8980_s11 + $0x10] sm:$0xff]  ;;  %v67_v3 = vld [vmem:[%s8980_s11 + $0x18] sm:$0xff] }
 0xe77   :  { %v8744_v18 = vadd.f32 %v7743_v15, %v6188_v28  ;;  %6202 = vadd.xlane.f32.xlu1 %v6201_v51 }
 0xe78   :  { %v8749_v63 = vadd.f32 %v7744_v27, %v6187_v58  ;;  %7488 = vmatprep.subr.bf16.mxu0 %v7487_v36 }
 0xe79   :  { %v6210_v1 = vsel %vm89_vm0, %v8744_v18, 0.0 }
 0xe7a   :  { %v6207_v56 = vsel %vm89_vm0, %v8749_v63, 0.0  ;;  %7490 = vmatpush3.bf16.msra.mxu0 %v7487_v36  ;;  %v7495_v36 = vpack.c.bf16 %v67_v3, %v66_v29 }
 0xe7b   :  { %6211 = vadd.xlane.f32.xlu1 %v6210_v1  ;;  %6208 = vadd.xlane.f32.xlu0 %v6207_v56 }
 0xf03   :  { %v6206_v10 = vpop.xlane.xlu0 %6205  ;;  %v7407_v2 = vpop.f32.mrb[42].mxu1 }
 0xf04   :  { %v6203_v13 = vpop.xlane.xlu1 %6202  ;;  %v7529_v32 = vadd.f32 %v7407_v2, %v8429_v5  ;;  %v6152_v35 = vpop.f32.mrb[43].mxu1  ;;  %v6226_v20 = vmul.f32 0.03125, %v6206_v10  ;;  %v7746_v5 = vld [vmem:[%s8969_s0 + $0x20] sm:$0xff] }
 0xf05   :  { %v7530_v23 = vadd.f32 %v6152_v35, %v8431_v31  ;;  %v6225_v40 = vmul.f32 0.03125, %v6203_v13 }
 0xf06   :  { %v6190_v37 = vadd.f32 %v7529_v32, %v6790_v45  ;;  %v8763_v12 = vsub.f32 %v8728_v7, %v6226_v20 }
 0xf07   :  { %v6189_v41 = vadd.f32 %v7530_v23, %v6790_v45  ;;  %v7410_v44 = vpop.f32.mrb[36].mxu1  ;;  %v8778_v53 = vsub.f32 %v8734_v17, %v6225_v40 }
 0xf08   :  { %v8760_v60 = vadd.f32 %v7745_v49, %v6190_v37  ;;  %v6212_v62 = vpop.xlane.xlu1 %6211  ;;  %v6209_v33 = vpop.xlane.xlu0 %6208  ;;  %v6192_v47 = vadd.f32 %v7410_v44, %v6790_v45  ;;  %v6242_v0 = vmul.f32 %v8763_v12, %v8763_v12 }
 0xf09   :  { %v8768_v31 = vadd.f32 %v7746_v5, %v6189_v41  ;;  %v6162_v16 = vpop.f32.mrb[37].mxu1  ;;  %v6228_v22 = vmul.f32 0.03125, %v6212_v62  ;;  %v6227_v19 = vmul.f32 0.03125, %v6209_v33  ;;  %v6241_v6 = vmul.f32 %v8778_v53, %v8778_v53 }
 0xf0a   :  { %v8773_v52 = vadd.f32 %v7747_v9, %v6192_v47  ;;  %v6191_v14 = vadd.f32 %v6790_v45, %v6162_v16  ;;  %v6216_v26 = vsel %vm89_vm0, %v8760_v60, 0.0  ;;  %v6252_v4 = vsel %vm89_vm0, %v6242_v0, 0.0  ;;  %v8855_v0 = vld [vmem:[%s8977_s8] ss:$0 sm:$0xff] }
 0xf0b   :  { %6217 = vadd.xlane.f32.xlu1 %v6216_v26  ;;  %v6213_v25 = vsel %vm89_vm0, %v8768_v31, 0.0  ;;  %v8788_v54 = vsub.f32 %v8744_v18, %v6228_v22  ;;  %v8795_v48 = vsub.f32 %v8749_v63, %v6227_v19  ;;  %v6249_v8 = vsel %vm89_vm0, %v6241_v6, 0.0  ;;  %v8848_v19 = vld [vmem:[%s8976_s7] ss:$0 sm:$0xff] }
 0xf0c   :  { %v8785_v59 = vadd.f32 %v7748_v30, %v6191_v14  ;;  %6214 = vadd.xlane.f32.xlu0 %v6213_v25  ;;  %v6222_v55 = vsel %vm89_vm0, %v8773_v52, 0.0 }
 0xf0d   :  { %v6244_v11 = vmul.f32 %v8788_v54, %v8788_v54  ;;  %v6243_v45 = vmul.f32 %v8795_v48, %v8795_v48 }
 0xf0e   :  { %v6219_v39 = vsel %vm89_vm0, %v8785_v59, 0.0 }
 0xf0f   :  { %6223 = vadd.xlane.f32.xlu1 %v6222_v55  ;;  %v6258_v42 = vsel %vm89_vm0, %v6244_v11, 0.0  ;;  %v6255_v21 = vsel %vm89_vm0, %v6243_v45, 0.0 }
 0xf10   :  { %6220 = vadd.xlane.f32.xlu0 %v6219_v39 }
 0xf13   :  { %6253 = vadd.xlane.f32.xlu1 %v6252_v4 }
 0xf14   :  { %6250 = vadd.xlane.f32.xlu0 %v6249_v8 }
 0xf17   :  { %6259 = vadd.xlane.f32.xlu1 %v6258_v42 }
 0xf18   :  { %6256 = vadd.xlane.f32.xlu0 %v6255_v21 }
 0xf98   :  { %v6218_v38 = vpop.xlane.xlu1 %6217 }
 0xf99   :  { %v6230_v57 = vmul.f32 0.03125, %v6218_v38  ;;  %v6215_v43 = vpop.xlane.xlu0 %6214  ;;  %v68_v38 = vld [vmem:[%s8980_s11 + $0x20] sm:$0xff] }
 0xf9a   :  { %v6229_v24 = vmul.f32 0.03125, %v6215_v43 }
 0xf9b   :  { %v8822_v28 = vsub.f32 %v8760_v60, %v6230_v57  ;;  %v69_v57 = vld [vmem:[%s8980_s11 + $0x28] sm:$0xff] }
 0xf9c   :  { %v8825_v50 = vsub.f32 %v8768_v31, %v6229_v24  ;;  %v6224_v58 = vpop.xlane.xlu1 %6223  ;;  %v7499_v43 = vpack.c.bf16 %v69_v57, %v68_v38  ;;  %v70_v24 = vld [vmem:[%s8980_s11 + $0x30] sm:$0xff] }
 0xf9d   :  { %v6232_v51 = vmul.f32 0.03125, %v6224_v58  ;;  %v6221_v15 = vpop.xlane.xlu0 %6220  ;;  %v6246_v27 = vmul.f32 %v8822_v28, %v8822_v28  ;;  %v71_v58 = vld [vmem:[%s8980_s11 + $0x38] sm:$0xff] }
 0xf9e   :  { %v6231_v1 = vmul.f32 0.03125, %v6221_v15  ;;  %v6245_v56 = vmul.f32 %v8825_v50, %v8825_v50  ;;  %v72_v15 = vld [vmem:[%s8980_s11 + $0x40] sm:$0xff] }
 0xf9f   :  { %v8832_v10 = vsub.f32 %v8773_v52, %v6232_v51  ;;  %v6264_v2 = vsel %vm89_vm0, %v6246_v27, 0.0  ;;  %v7503_v51 = vpack.c.bf16 %v71_v58, %v70_v24  ;;  %v73_v27 = vld [vmem:[%s8980_s11 + $0x48] sm:$0xff] }
 0xfa0   :  { %v8836_v13 = vsub.f32 %v8785_v59, %v6231_v1  ;;  %6265 = vadd.xlane.f32.xlu1 %v6264_v2  ;;  %v6254_v32 = vpop.xlane.xlu1 %6253  ;;  %v6261_v35 = vsel %vm89_vm0, %v6245_v56, 0.0  ;;  %v7507_v1 = vpack.c.bf16 %v73_v27, %v72_v15  ;;  %v74_v56 = vld [vmem:[%s8980_s11 + $0x50] sm:$0xff]  ;;  %v75_v2 = vld [vmem:[%s8980_s11 + $0x58] sm:$0xff] }
 0xfa1   :  { %v6274_v20 = vmul.f32 0.03125, %v6254_v32  ;;  %6262 = vadd.xlane.f32.xlu0 %v6261_v35  ;;  %v6251_v23 = vpop.xlane.xlu0 %6250  ;;  %v6248_v37 = vmul.f32 %v8832_v10, %v8832_v10  ;;  %v7511_v32 = vpack.c.bf16 %v75_v2, %v74_v56  ;;  %v76_v35 = vld [vmem:[%s8980_s11 + $0x60] sm:$0xff] }
 0xfa2   :  { %v6273_v40 = vmul.f32 0.03125, %v6251_v23  ;;  %v6247_v41 = vmul.f32 %v8836_v13, %v8836_v13 }
 0xfa3   :  { %v6282_v44 = vadd.f32 1e-06, %v6274_v20  ;;  %v6270_v49 = vsel %vm89_vm0, %v6248_v37, 0.0  ;;  %v77_v20 = vld [vmem:[%s8980_s11 + $0x68] sm:$0xff]  ;;  %v78_v37 = vld [vmem:[%s8980_s11 + $0x70] sm:$0xff] }
 0xfa4   :  { %v6281_v62 = vadd.f32 1e-06, %v6273_v40  ;;  %6271 = vadd.xlane.f32.xlu1 %v6270_v49  ;;  %v6260_v33 = vpop.xlane.xlu1 %6259  ;;  %v6267_v47 = vsel %vm89_vm0, %v6247_v41, 0.0  ;;  %v7515_v23 = vpack.c.bf16 %v77_v20, %v76_v35  ;;  %v79_v40 = vld [vmem:[%s8980_s11 + $0x78] sm:$0xff] }
 0xfa5   :  { %7709 = vrsqrt.f32 %v6282_v44  ;;  %v6276_v5 = vmul.f32 0.03125, %v6260_v33  ;;  %6268 = vadd.xlane.f32.xlu0 %v6267_v47  ;;  %v6257_v16 = vpop.xlane.xlu0 %6256  ;;  %v7519_v41 = vpack.c.bf16 %v79_v40, %v78_v37 }
 0xfa6   :  { %7711 = vrsqrt.f32 %v6281_v62  ;;  %v6275_v22 = vmul.f32 0.03125, %v6257_v16 }
 0xfa7   :  { %v6284_v9 = vadd.f32 1e-06, %v6276_v5 }
 0xfa8   :  { %v6283_v14 = vadd.f32 1e-06, %v6275_v22 }
 0xfa9   :  { %7713 = vrsqrt.f32 %v6284_v9 }
 0xfaa   :  { %7715 = vrsqrt.f32 %v6283_v14 }
 0xfaf   :  { %v7710_v26 = vpop.eup %7709 }
 0xfb0   :  { %v7712_v25 = vpop.eup %7711  ;;  %v6298_v30 = vmul.f32 %v7710_v26, %v8763_v12 }
 0xfb1   :  { %v6297_v55 = vmul.f32 %v7712_v25, %v8778_v53 }
 0xfb2   :  { %v6312_v39 = vmul.f32 %v8848_v19, %v6298_v30 }
 0xfb3   :  { %v7714_v6 = vpop.eup %7713  ;;  %v6311_v4 = vmul.f32 %v8848_v19, %v6297_v55 }
 0xfb4   :  { %v7716_v11 = vpop.eup %7715  ;;  %v6300_v8 = vmul.f32 %v7714_v6, %v8788_v54  ;;  %v6326_v12 = vadd.f32 %v8855_v0, %v6312_v39  ;;  %v64_v54 = vld [vmem:[%s8980_s11] sm:$0xff] }
 0xfb5   :  { %v6325_v45 = vadd.f32 %v8855_v0, %v6311_v4  ;;  %v6299_v42 = vmul.f32 %v7716_v11, %v8795_v48  ;;  %v65_v48 = vld [vmem:[%s8980_s11 + $0x8] sm:$0xff] }
 0xfb6   :  { %v6314_v53 = vmul.f32 %v8848_v19, %v6300_v8  ;;  %v7491_v61 = vpack.c.bf16 %v65_v48, %v64_v54 }
 0xfb7   :  { %7419 = vmatprep.mubr.msk.f32.mxu0 %vm89_vm0, %v6325_v45  ;;  %v6313_v21 = vmul.f32 %v8848_v19, %v6299_v42 }
 0xfb8   :  { %7420 = vmatmul.mubr.msk.f32.vlgmr.msra.gmra.mrb[86].mxu0 %vm89_vm0, %v6326_v12  ;;  %v6328_v34 = vadd.f32 %v8855_v0, %v6314_v53  ;;  %7492 = vmatprep.subr.bf16.mxu1 %v7491_v61 }
 0xfb9   :  { %v6327_v46 = vadd.f32 %v8855_v0, %v6313_v21  ;;  %7494 = vmatpush3.bf16.msra.mxu1 %v7491_v61 }
 0xfba   :  { %7496 = vmatprep.subr.bf16.mxu1 %v7495_v36 }
 0xfbb   :  { %7422 = vmatprep.mubr.msk.f32.mxu0 %vm89_vm0, %v6327_v46 }
 0xfbc   :  { %7423 = vmatmul.mubr.msk.f32.gmra.mrb[88].mxu0 %vm89_vm0, %v6328_v34 }
 0xfbd   :  { %7498 = vmatpush3.bf16.msra.mxu1 %v7495_v36 }
 0xfbe   :  { %7500 = vmatprep.subr.bf16.mxu1 %v7499_v43 }
 0xfc1   :  { %7502 = vmatpush3.bf16.msra.mxu1 %v7499_v43 }
 0xfc2   :  { %7504 = vmatprep.subr.bf16.mxu1 %v7503_v51 }
 0xfc5   :  { %7506 = vmatpush3.bf16.msra.mxu1 %v7503_v51 }
 0xfc6   :  { %7508 = vmatprep.subr.bf16.mxu1 %v7507_v1 }
 0xfc9   :  { %7510 = vmatpush3.bf16.msra.mxu1 %v7507_v1 }
 0xfca   :  { %7512 = vmatprep.subr.bf16.mxu1 %v7511_v32 }
 0xfcd   :  { %7514 = vmatpush3.bf16.msra.mxu1 %v7511_v32 }
 0xfce   :  { %7516 = vmatprep.subr.bf16.mxu1 %v7515_v23 }
 0xfd1   :  { %7518 = vmatpush3.bf16.msra.mxu1 %v7515_v23 }
 0xfd2   :  { %7520 = vmatprep.subr.bf16.mxu1 %v7519_v41 }
 0xfd5   :  { %7522 = vmatpush3.bf16.msra.mxu1 %v7519_v41 }
0x102d   :  { %v6266_v44 = vpop.xlane.xlu1 %6265 }
0x102e   :  { %v6278_v49 = vmul.f32 0.03125, %v6266_v44  ;;  %v6263_v62 = vpop.xlane.xlu0 %6262 }
0x102f   :  { %v6277_v33 = vmul.f32 0.03125, %v6263_v62 }
0x1030   :  { %v6286_v47 = vadd.f32 1e-06, %v6278_v49 }
0x1031   :  { %v6285_v5 = vadd.f32 1e-06, %v6277_v33  ;;  %v6272_v16 = vpop.xlane.xlu1 %6271 }
0x1032   :  { %7717 = vrsqrt.f32 %v6286_v47  ;;  %v6280_v22 = vmul.f32 0.03125, %v6272_v16  ;;  %v6269_v9 = vpop.xlane.xlu0 %6268 }
0x1033   :  { %7719 = vrsqrt.f32 %v6285_v5  ;;  %v6279_v14 = vmul.f32 0.03125, %v6269_v9 }
0x1034   :  { %v6288_v26 = vadd.f32 1e-06, %v6280_v22 }
0x1035   :  { %v6287_v25 = vadd.f32 1e-06, %v6279_v14 }
0x1036   :  { %7721 = vrsqrt.f32 %v6288_v26 }
0x1037   :  { %7723 = vrsqrt.f32 %v6287_v25 }
0x103c   :  { %v7718_v30 = vpop.eup %7717 }
0x103d   :  { %v7720_v55 = vpop.eup %7719  ;;  %v6302_v39 = vmul.f32 %v7718_v30, %v8822_v28 }
0x103e   :  { %v6301_v6 = vmul.f32 %v7720_v55, %v8825_v50 }
0x103f   :  { %v6316_v4 = vmul.f32 %v8848_v19, %v6302_v39 }
0x1040   :  { %v7722_v11 = vpop.eup %7721  ;;  %v6315_v8 = vmul.f32 %v8848_v19, %v6301_v6 }
0x1041   :  { %v7724_v45 = vpop.eup %7723  ;;  %v6304_v42 = vmul.f32 %v7722_v11, %v8832_v10  ;;  %v6330_v21 = vadd.f32 %v8855_v0, %v6316_v4  ;;  %v6793_v10 = vld [vmem:[%s8979_s10] ss:$0 sm:$0xff] }
0x1042   :  { %v6329_v12 = vadd.f32 %v8855_v0, %v6315_v8  ;;  %v6303_v53 = vmul.f32 %v7724_v45, %v8836_v13 }
0x1043   :  { %v6318_v46 = vmul.f32 %v8848_v19, %v6304_v42 }
0x1044   :  { %7425 = vmatprep.mubr.msk.f32.mxu0 %vm89_vm0, %v6329_v12  ;;  %v6317_v28 = vmul.f32 %v8848_v19, %v6303_v53 }
0x1045   :  { %7426 = vmatmul.mubr.msk.f32.gmra.mrb[90].mxu0 %vm89_vm0, %v6330_v21  ;;  %v6332_v34 = vadd.f32 %v8855_v0, %v6318_v46 }
0x1046   :  { %v6331_v50 = vadd.f32 %v8855_v0, %v6317_v28 }
0x1048   :  { %7428 = vmatprep.mubr.msk.f32.mxu0 %vm89_vm0, %v6331_v50 }
0x1049   :  { %7429 = vmatmul.mubr.msk.f32.gmra.mrb[92].mxu0 %vm89_vm0, %v6332_v34 }
0x108b   :  { %v7421_v13 = vpop.f32.mrb[86].mxu0 }
0x108c   :  { %v6435_v54 = vadd.f32 %v7421_v13, %v6793_v10  ;;  %v6429_v48 = vpop.f32.mrb[87].mxu0  ;;  %v6802_v13 = vld [vmem:[%s8981_s12] ss:$0 sm:$0xff]  ;;  %s7786_s12 = smov [#allocation2]  }
0x108d   :  { %v6430_v29 = vadd.f32 %v6793_v10, %v6429_v48  ;;  %s6640_s23 = sshll.u32 %s7786_s12, 4  ;;  %s6641_s23 = int_to_ptr.vmem [resolvable:$true] %s6640_s23 }
0x108e   :  { %v6477_v61 = vmul.f32 0.70710677, %v6435_v54  ;;  %v6469_v1 = vmul.f32 0.5, %v6435_v54  ;;  %s7749_s24 = scalar_lea.vmem %s6641_s23, 1024  ;;  %p7754_p1 = scmp.lt.s32.totalorder %s6641_s23, %s6641_s23 }
0x108f   :  { %v6476_v19 = vmul.f32 0.70710677, %v6430_v29  ;;  %v7424_v3 = vpop.f32.mrb[88].mxu0  ;;  %v6468_v15 = vmul.f32 0.5, %v6430_v29  ;;  %p7750_p0 = scmp.ne.s32.totalorder %s6641_s23, %s7749_s24  ;;  %p7755_p2 = scmp.lt.s32.totalorder %s7749_s24, %s7749_s24 }
0x1090   :  { %7725 = verf.f32 %v6477_v61  ;;  %v6445_v36 = vadd.f32 %v7424_v3, %v6793_v10  ;;  %v6439_v38 = vpop.f32.mrb[89].mxu0 }
0x1091   :  { %7727 = verf.f32 %v6476_v19  ;;  %v6440_v0 = vadd.f32 %v6793_v10, %v6439_v38  ;;  %p7756_p3 = por %p7755_p2, %p7754_p1 }
0x1092   :  { %v6479_v57 = vmul.f32 0.70710677, %v6445_v36  ;;  %v6471_v40 = vmul.f32 0.5, %v6445_v36 }
0x1093   :  { %v6478_v43 = vmul.f32 0.70710677, %v6440_v0  ;;  %v6470_v23 = vmul.f32 0.5, %v6440_v0  ;;  %p7757_p4 = pnand %p7756_p3, %p7750_p0 }
0x1094   :  { %7729 = verf.f32 %v6479_v57 }
0x1095   :  { %7731 = verf.f32 %v6478_v43 }
0x109a   :  { %v7726_v24 = vpop.eup %7725 }
0x109b   :  { %v7728_v58 = vpop.eup %7727  ;;  %v6493_v51 = vadd.f32 1.0, %v7726_v24 }
0x109c   :  { %v6492_v27 = vadd.f32 1.0, %v7728_v58 }
0x109d   :  { %v6501_v35 = vmul.f32 %v6493_v51, %v6469_v1 }
0x109e   :  { %v7730_v56 = vpop.eup %7729  ;;  %v6500_v2 = vmul.f32 %v6492_v27, %v6468_v15 }
0x109f   :  { %v7732_v32 = vpop.eup %7731  ;;  %v6495_v20 = vadd.f32 1.0, %v7730_v56 }
0x10a0   :  { %v6494_v37 = vadd.f32 1.0, %v7732_v32  ;;  %7463 = vmatprep.mubr.f32.mxu1 %v6500_v2 }
0x10a1   :  { %7464 = vmatmul.mubr.f32.vlgmr.msra.gmra.mrb[64].mxu1 %v6501_v35  ;;  %v6503_v44 = vmul.f32 %v6495_v20, %v6471_v40 }
0x10a2   :  { %v6502_v41 = vmul.f32 %v6494_v37, %v6470_v23 }
0x10a4   :  { %7466 = vmatprep.mubr.f32.mxu1 %v6502_v41 }
0x10a5   :  { %7467 = vmatmul.mubr.f32.gmra.mrb[66].mxu1 %v6503_v44 }
0x1118   :  { %v7427_v49 = vpop.f32.mrb[90].mxu0 }
0x1119   :  { %v6455_v62 = vadd.f32 %v7427_v49, %v6793_v10  ;;  %v6449_v33 = vpop.f32.mrb[91].mxu0 }
0x111a   :  { %v6450_v47 = vadd.f32 %v6793_v10, %v6449_v33 }
0x111b   :  { %v6481_v5 = vmul.f32 0.70710677, %v6455_v62  ;;  %v6473_v8 = vmul.f32 0.5, %v6455_v62 }
0x111c   :  { %v6480_v16 = vmul.f32 0.70710677, %v6450_v47  ;;  %v7430_v22 = vpop.f32.mrb[92].mxu0  ;;  %v6472_v4 = vmul.f32 0.5, %v6450_v47 }
0x111d   :  { %7733 = verf.f32 %v6481_v5  ;;  %v6465_v9 = vadd.f32 %v7430_v22, %v6793_v10  ;;  %v6459_v14 = vpop.f32.mrb[93].mxu0 }
0x111e   :  { %7735 = verf.f32 %v6480_v16  ;;  %v6460_v26 = vadd.f32 %v6793_v10, %v6459_v14 }
0x111f   :  { %v6483_v25 = vmul.f32 0.70710677, %v6465_v9  ;;  %v6475_v50 = vmul.f32 0.5, %v6465_v9 }
0x1120   :  { %v6482_v30 = vmul.f32 0.70710677, %v6460_v26  ;;  %v6474_v46 = vmul.f32 0.5, %v6460_v26 }
0x1121   :  { %7737 = verf.f32 %v6483_v25 }
0x1122   :  { %7739 = verf.f32 %v6482_v30 }
0x1127   :  { %v7734_v55 = vpop.eup %7733 }
0x1128   :  { %v7736_v39 = vpop.eup %7735  ;;  %v6497_v6 = vadd.f32 1.0, %v7734_v55 }
0x1129   :  { %v6496_v11 = vadd.f32 1.0, %v7736_v39 }
0x112a   :  { %v6505_v21 = vmul.f32 %v6497_v6, %v6473_v8 }
0x112b   :  { %v7738_v45 = vpop.eup %7737  ;;  %v6504_v42 = vmul.f32 %v6496_v11, %v6472_v4 }
0x112c   :  { %v7740_v12 = vpop.eup %7739  ;;  %v6499_v53 = vadd.f32 1.0, %v7738_v45 }
0x112d   :  { %v6498_v28 = vadd.f32 1.0, %v7740_v12  ;;  %7469 = vmatprep.mubr.f32.mxu1 %v6504_v42 }
0x112e   :  { %7470 = vmatmul.mubr.f32.gmra.mrb[68].mxu1 %v6505_v21  ;;  %v6507_v10 = vmul.f32 %v6499_v53, %v6475_v50 }
0x112f   :  { %v6506_v34 = vmul.f32 %v6498_v28, %v6474_v46 }
0x1131   :  { %7472 = vmatprep.mubr.f32.mxu1 %v6506_v34 }
0x1132   :  { %7473 = vmatmul.mubr.f32.gmra.mrb[70].mxu1 %v6507_v10 }
0x1174   :  { %v7465_v54 = vpop.f32.mrb[64].mxu1 }
0x1175   :  { %v6586_v48 = vadd.f32 %v7465_v54, %v6802_v13  ;;  %v6580_v29 = vpop.f32.mrb[65].mxu1 }
0x1176   :  { %v6581_v61 = vadd.f32 %v6802_v13, %v6580_v29 }
0x1177   :  { %v6620_v19 = vadd.f32 %v6586_v48, %v8728_v7 }
0x1178   :  { %v6619_v3 = vadd.f32 %v6581_v61, %v8734_v17  ;;  %v7468_v36 = vpop.f32.mrb[66].mxu1 }
0x1179   :  { %6628 = vst.msk [vmem:[#allocation2 + $0x8] sm:$0xff] %vm89_vm0, %v6620_v19  ;;  %v6596_v38 = vadd.f32 %v7468_v36, %v6802_v13  ;;  %v6590_v0 = vpop.f32.mrb[67].mxu1 }
0x117a   :  { %6627 = vst.msk [vmem:[#allocation2] sm:$0xff] %vm89_vm0, %v6619_v3  ;;  %v6591_v57 = vadd.f32 %v6802_v13, %v6590_v0 }
0x117b   :  { %v6622_v43 = vadd.f32 %v6596_v38, %v8744_v18 }
0x117c   :  { %v6621_v24 = vadd.f32 %v6591_v57, %v8749_v63 }
0x117d   :  { %6630 = vst.msk [vmem:[#allocation2 + $0x18] sm:$0xff] %vm89_vm0, %v6622_v43 }
0x117e   :  { %6629 = vst.msk [vmem:[#allocation2 + $0x10] sm:$0xff] %vm89_vm0, %v6621_v24 }
0x1201   :  { %v7471_v58 = vpop.f32.mrb[68].mxu1 }
0x1202   :  { %v6606_v7 = vadd.f32 %v7471_v58, %v6802_v13  ;;  %v6600_v51 = vpop.f32.mrb[69].mxu1 }
0x1203   :  { %v6601_v17 = vadd.f32 %v6802_v13, %v6600_v51 }
0x1204   :  { %v6624_v15 = vadd.f32 %v6606_v7, %v8760_v60 }
0x1205   :  { %v6623_v27 = vadd.f32 %v6601_v17, %v8768_v31  ;;  %v7474_v1 = vpop.f32.mrb[70].mxu1 }
0x1206   :  { %6632 = vst.msk [vmem:[#allocation2 + $0x28] sm:$0xff] %vm89_vm0, %v6624_v15  ;;  %v6616_v56 = vadd.f32 %v7474_v1, %v6802_v13  ;;  %v6610_v2 = vpop.f32.mrb[71].mxu1 }
0x1207   :  { %6631 = vst.msk [vmem:[#allocation2 + $0x20] sm:$0xff] %vm89_vm0, %v6623_v27  ;;  %v6611_v18 = vadd.f32 %v6802_v13, %v6610_v2 }
0x1208   :  { %v6626_v63 = vadd.f32 %v6616_v56, %v8773_v52 }
0x1209   :  { %v6625_v32 = vadd.f32 %v6611_v18, %v8785_v59 }
0x120a   :  { %6634 = vst.msk [vmem:[#allocation2 + $0x38] sm:$0xff] %vm89_vm0, %v6626_v63 }
0x120b   :  { %6633 = vst.msk [vmem:[#allocation2 + $0x30] sm:$0xff] %vm89_vm0, %v6625_v32 }
0x120c   :  { %7760 = shalt.err (!%p7757_p4)
}
0x120d   :  { %s7761_s27 = scalar_lea.hbm %s8982_s13, 1024 }
0x120e   :  { %p7762_p5 = scmp.ne.s32.totalorder %s8982_s13, %s7761_s27  ;;  %p7765_p6 = scmp.lt.u32.totalorder %s7761_s27, %s8982_s13 }
0x1210   :  { %p7767_p7 = pnand %p7765_p6, %p7762_p5 }
0x1212   :  { %7770 = shalt.err (!%p7767_p7)
}
0x1213   :  { %s7787_s14 = smov 128   ;;  %s7788_s3 = smov 8  }
0x1214   :  { %6646 = dma.vmem_to_hbm [thread:$0]  %s6641_s23, 1024, %s8982_s13, [#allocation3], %s7787_s14, %s7787_s14, %s7788_s3  }
0x1215   :  { %7771 = dma.done.wait [#allocation3], 1024  }
0x1216   :  { %7772 = vsyncadd [#allocation3], 4294966272 }
0x1217   :  { %6650 = vsyncpa [#allocation3], 1 }

</bundles_post_ra>
